<compile_context>
chip_gen: v7x
topology: tpu7x:2x2x1
jax: 0.10.0
libtpu: 0.0.40
codegen_flags: <defaults>
</compile_context>

<pallas_src>
import functools
from typing import NamedTuple, Optional, Tuple

import numpy as np
import jax
import jax.numpy as jnp
from jax.experimental import pallas as pl
from jax.experimental.pallas import tpu as pltpu


def _round_up(v, m):
    return (v + m - 1) // m * m


class _Cfg(NamedTuple):
    n: int
    d: int
    tile: int
    n_pad: int
    m_pad: int
    segs: Tuple[Tuple[int, int, int], ...]   # per camera: (lo, hi, lane_pad)
    inv_beta: float
    matmul_in_bf16: bool
    labels_in_bf16: bool
    vmem_limit: int
    bank_buffer_count: Optional[int]


def _old_cls_target_kernel(x_ref, em_ref, y_ref, bias_ref, out_ref, *,
                           seg_slices, inv_beta, inv_num_cam,
                           matmul_in_bf16, any_padding):
    """One grid step = one tile of rows; writes that tile's partial loss sum."""
    x = x_ref[...].astype(jnp.float32)                            # (TN, D)
    # F.normalize(x, dim=1); fold 1/t_beta into the normalized features so the
    # (TN, M_pad) logits need no extra scaling pass (rsqrt -> EUP slot).
    ssq = jnp.sum(x * x, axis=1, keepdims=True)
    x = x * (jax.lax.rsqrt(jnp.maximum(ssq, 1e-24)) * inv_beta)
    # nn.Dropout(p=0.5): eval-mode identity.
    if matmul_in_bf16:
        x = x.astype(jnp.bfloat16)                                # bank already bf16
    logits = jnp.dot(x, em_ref[...], preferred_element_type=jnp.float32)  # (TN, M_pad)
    if any_padding:
        # 0 on real class columns, -1e30 on padded columns -> padded columns drop
        # out of every per-camera softmax with a single broadcast add.
        logits = logits + bias_ref[...]

    y = y_ref[...].astype(jnp.float32)                            # pre-normalized labels
    per_row = jnp.zeros((x.shape[0], 1), jnp.float32)
    # Static camera loop; lo/hi are multiples of 128 -> every slice is lane-aligned.
    for lo, hi in seg_slices:
        lg = logits[:, lo:hi]
        mx = jnp.max(lg, axis=1, keepdims=True)
        lse = mx + jnp.log(jnp.sum(jnp.exp(lg - mx), axis=1, keepdims=True))
        ys = y[:, lo:hi]                                          # padded cols are 0
        # sum_m(y * (lse - logit)) == sum(y)*lse - sum(y*logit)
        per_row = per_row + (jnp.sum(ys, axis=1, keepdims=True) * lse
                             - jnp.sum(ys * lg, axis=1, keepdims=True))

    tile_loss = jnp.sum(per_row, axis=0, keepdims=True) * inv_num_cam   # (1, 1)
    out_ref[...] = jnp.broadcast_to(tile_loss.reshape(1, 1, 1), out_ref.shape)


def _forward_impl(x, em_all, labels, *, cfg: _Cfg):
    n, d = cfg.n, cfg.d
    num_cam = len(cfg.segs)
    bank_dtype = jnp.bfloat16 if cfg.matmul_in_bf16 else jnp.float32
    label_dtype = jnp.bfloat16 if cfg.labels_in_bf16 else jnp.float32

    # ---- one-pass, fused-by-XLA layout prep (runs inside this jit) --------------
    x_pad = jnp.pad(x.astype(jnp.float32), ((0, cfg.n_pad - n), (0, 0)))

    em_parts, y_parts, seg_slices = [], [], []
    bias_np = np.zeros((1, cfg.m_pad), np.float32)
    col = 0
    any_padding = False
    for (lo, hi, pad) in cfg.segs:
        cls = hi - lo
        # label max-normalization done here (f32), exactly as y / (max + 1e-20)
        y_c = labels[:, lo:hi].astype(jnp.float32)
        y_c = y_c / (jnp.max(y_c, axis=1, keepdims=True) + 1e-20)
        y_parts.append(jnp.pad(y_c, ((0, cfg.n_pad - n), (0, pad))).astype(label_dtype))
        em_c = em_all[lo:hi, :].astype(bank_dtype).T               # (D, cls)
        em_parts.append(jnp.pad(em_c, ((0, 0), (0, pad))))
        seg_slices.append((col, col + cls + pad))
        if pad:
            bias_np[0, col + cls: col + cls + pad] = -1e30
            any_padding = True
        col += cls + pad
    labels_pad = jnp.concatenate(y_parts, axis=1)                  # (n_pad, M_pad)
    em_t_pad = jnp.concatenate(em_parts, axis=1)                   # (D, M_pad)
    bias = jnp.asarray(bias_np)                                    # (1, M_pad)

    kernel = functools.partial(
        _old_cls_target_kernel,
        seg_slices=tuple(seg_slices),
        inv_beta=cfg.inv_beta,
        inv_num_cam=1.0 / num_cam,
        matmul_in_bf16=cfg.matmul_in_bf16,
        any_padding=any_padding,
    )

    if cfg.bank_buffer_count is not None:
        # Optional: single/multi-buffering hint for the constant bank block.
        em_spec = pl.BlockSpec((d, cfg.m_pad), lambda i: (0, 0),
                               pipeline_mode=pl.Buffered(cfg.bank_buffer_count))
    else:
        em_spec = pl.BlockSpec((d, cfg.m_pad), lambda i: (0, 0))

    num_tiles = cfg.n_pad // cfg.tile
    partials = pl.pallas_call(
        kernel,
        out_shape=jax.ShapeDtypeStruct((num_tiles, 8, 128), jnp.float32),
        grid_spec=pltpu.PrefetchScalarGridSpec(
            num_scalar_prefetch=0,
            grid=(num_tiles,),
            in_specs=[
                pl.BlockSpec((cfg.tile, d), lambda i: (i, 0)),         # x row tile
                em_spec,                                               # bank (D, M_pad)
                pl.BlockSpec((cfg.tile, cfg.m_pad), lambda i: (i, 0)),  # label row tile
                pl.BlockSpec((1, cfg.m_pad), lambda i: (0, 0)),         # softmax mask row
            ],
            out_specs=pl.BlockSpec((1, 8, 128), lambda i: (i, 0, 0)),   # lane-dense partials
        ),
        compiler_params=pltpu.CompilerParams(
            dimension_semantics=("parallel",),       # independent row tiles (megacore)
            vmem_limit_bytes=cfg.vmem_limit),
    )(x_pad, em_t_pad, labels_pad, bias)

    # Per-tile partial sums -> mean over the true batch (padded rows contribute 0).
    return jnp.sum(partials[:, 0, 0]) / jnp.float32(n)


_forward_jit = jax.jit(_forward_impl, static_argnames=("cfg",))


def _physical_vmem_bytes():
    try:
        info = pltpu.get_tpu_info()
        return int(getattr(info, "vmem_capacity_bytes", 64 * 1024 * 1024))
    except Exception:   # capability probe only; 64 MiB = smallest (v7x per-core) VMEM
        return 64 * 1024 * 1024


def old_cls_target_forward(x, em_all, labels, t_cam_ids, t_beta, *,
                           tile_n=256, matmul_in_bf16=True, labels_in_bf16=None,
                           bank_buffer_count=None):
    """Scalar loss of OldClsTarget.forward (labels-tensor, use_single=False path).

    matmul_in_bf16: store the bank in bf16 and feed the MXU bf16 inputs with f32
        accumulation (default True; use False for strict f32 validation runs).
    labels_in_bf16: store the padded/normalized label tiles in bf16 (defaults to
        matmul_in_bf16); halves the dominant per-step HBM stream.
    bank_buffer_count: optional pl.Buffered(n) hint for the constant bank block
        (e.g. 1 to single-buffer it on VMEM-tight v7x configs).
    """
    n, d = x.shape
    m = em_all.shape[0]
    t_cam_ids = tuple(int(c) for c in t_cam_ids)
    assert sum(t_cam_ids) == m
    assert labels.shape == (n, m)
    if labels_in_bf16 is None:
        labels_in_bf16 = matmul_in_bf16

    # Per-camera segments, each padded to a multiple of 128 lanes.
    offs = np.concatenate([[0], np.cumsum(t_cam_ids)]).astype(np.int64)
    segs, m_pad = [], 0
    for c, cls in enumerate(t_cam_ids):
        pad = _round_up(cls, 128) - cls
        segs.append((int(offs[c]), int(offs[c + 1]), int(pad)))
        m_pad += cls + pad

    # Row tile: multiple of 8, <= batch, and at least 2 tiles when the batch allows
    # it so the "parallel" axis can feed both TensorCores on dual-core parts (v7x).
    tile = _round_up(max(8, min(int(tile_n), n)), 8)
    if n > 8:
        tile = min(tile, _round_up(-(-n // 2), 8))
    n_pad = _round_up(n, tile)

    # VMEM budget: bank buffers + double-buffered x/label/out/bias tiles + f32 temps.
    bank_bytes = 2 if matmul_in_bf16 else 4
    label_bytes = 2 if labels_in_bf16 else 4
    bank_bufs = bank_buffer_count if bank_buffer_count is not None else 2
    vmem_needed = (bank_bufs * d * m_pad * bank_bytes
                   + 2 * tile * d * 4
                   + 2 * tile * m_pad * label_bytes
                   + 2 * m_pad * 4
                   + 2 * 8 * 128 * 4
                   + 4 * tile * m_pad * 4)
    phys = _physical_vmem_bytes()
    vmem_limit = int(min(phys - 8 * 1024 * 1024,                      # headroom on v7x
                         max(32 * 1024 * 1024, vmem_needed + 4 * 1024 * 1024)))

    cfg = _Cfg(n=n, d=d, tile=tile, n_pad=n_pad, m_pad=m_pad, segs=tuple(segs),
               inv_beta=float(1.0 / t_beta),
               matmul_in_bf16=bool(matmul_in_bf16),
               labels_in_bf16=bool(labels_in_bf16),
               vmem_limit=vmem_limit,
               bank_buffer_count=bank_buffer_count)
    return _forward_jit(x, em_all, labels, cfg=cfg)


def reference_forward(x, em_all, labels, t_cam_ids, t_beta):
    """Pure-JAX reference mirroring the PyTorch forward (labels-tensor path)."""
    x = x / jnp.maximum(jnp.linalg.norm(x, axis=1, keepdims=True), 1e-12)
    offs = np.concatenate([[0], np.cumsum(t_cam_ids)])
    num_cam = len(t_cam_ids)
    loss = jnp.float32(0.0)
    for c in range(num_cam):
        lo, hi = int(offs[c]), int(offs[c + 1])
        y = labels[:, lo:hi]
        y = y / (jnp.max(y, axis=1, keepdims=True) + 1e-20)
        logits = jnp.dot(x, em_all[lo:hi].T,
                         precision=jax.lax.Precision.HIGHEST) / t_beta
        logp = jax.nn.log_softmax(logits, axis=1)
        loss += (1.0 / num_cam) * jnp.mean(jnp.sum(-y * logp, axis=1))
    return loss


if __name__ == "__main__":
    key = jax.random.PRNGKey(0)
    N, D = 256, 128                     # batch, feature dim (in_dim)
    t_cam_ids = (130, 70, 56)           # classes per target camera (M = 256)
    M = int(sum(t_cam_ids))
    t_alpha, t_beta, t_switch = 0.01, 0.05, 1   # alpha/switch only affect backward

    k1, k2, k3, k4, k5 = jax.random.split(key, 5)
    x = jax.random.normal(k1, (N, D), jnp.float32)
    # __init__ zero-inits each em_c; use small deterministic random values so the
    # softmax numerics are non-degenerate (synthetic memory state).
    em_all = 0.05 * jax.random.normal(k2, (M, D), jnp.float32)
    labels = jax.nn.relu(jax.random.normal(k3, (N, M), jnp.float32))  # non-neg soft labels
    cams = jax.random.randint(k4, (N,), 0, len(t_cam_ids))  # unused by this forward path
    pids = jax.random.randint(k5, (N,), 0, M)                # unused by this forward path

    ref = reference_forward(x, em_all, labels, t_cam_ids, t_beta)

    # Default fast path: bf16 bank + bf16 labels + bf16 MXU inputs (f32 accumulate).
    # bf16 error on the 1/t_beta-amplified logits warrants a looser tolerance.
    loss_fast = old_cls_target_forward(x, em_all, labels, t_cam_ids, t_beta)
    loss_fast = jax.block_until_ready(loss_fast)
    np.testing.assert_allclose(np.asarray(loss_fast), np.asarray(ref),
                               rtol=2e-2, atol=2e-2)

    # Strict f32 path for validation.
    loss_f32 = old_cls_target_forward(x, em_all, labels, t_cam_ids, t_beta,
                                      matmul_in_bf16=False)
    loss_f32 = jax.block_until_ready(loss_f32)
    np.testing.assert_allclose(np.asarray(loss_f32), np.asarray(ref),
                               rtol=1e-4, atol=1e-4)

    print("KERNEL_OK")
</pallas_src>

<mosaic_0001>
module attributes {stable_mosaic.version = 11 : i64} {
  func.func @_old_cls_target_kernel(%arg0: i32, %arg1: memref<128x128xf32, #tpu.memory_space<vmem>>, %arg2: memref<128x512xbf16, #tpu.memory_space<vmem>>, %arg3: memref<128x512xbf16, #tpu.memory_space<vmem>>, %arg4: memref<1x512xf32, #tpu.memory_space<vmem>>, %arg5: memref<1x8x128xf32, #tpu.memory_space<vmem>>) attributes {dimension_semantics = [#tpu.dimension_semantics<parallel>], iteration_bounds = array<i64: 2>, scalar_prefetch = 0 : i64, scratch_operands = 0 : i64, tpu.core_type = #tpu.core_type<tc>, window_params = [{transform_indices = @transform_0, window_bounds = array<i64: 128, 128>}, {pipeline_mode = #tpu.pipeline_mode<synchronous>, transform_indices = @transform_1, window_bounds = array<i64: 128, 512>}, {transform_indices = @transform_2, window_bounds = array<i64: 128, 512>}, {pipeline_mode = #tpu.pipeline_mode<synchronous>, transform_indices = @transform_3, window_bounds = array<i64: 1, 512>}, {transform_indices = @transform_4, window_bounds = array<i64: 1, 8, 128>}]} {
    %c0 = arith.constant 0 : index
    %c0_0 = arith.constant 0 : index
    %0 = vector.load %arg1[%c0, %c0_0] : memref<128x128xf32, #tpu.memory_space<vmem>>, vector<128x128xf32>
    %1 = arith.mulf %0, %0 : vector<128x128xf32>
    %cst = arith.constant dense<0.000000e+00> : vector<128xf32>
    %2 = vector.multi_reduction <add>, %1, %cst [1] : vector<128x128xf32> to vector<128xf32>
    %3 = vector.shape_cast %2 : vector<128xf32> to vector<128x1xf32>
    %cst_1 = arith.constant 1.000000e-24 : f32
    %4 = vector.broadcast %cst_1 : f32 to vector<128x1xf32>
    %5 = arith.maximumf %3, %4 : vector<128x1xf32>
    %6 = math.rsqrt %5 : vector<128x1xf32>
    %cst_2 = arith.constant 2.000000e+01 : f32
    %7 = vector.broadcast %cst_2 : f32 to vector<128x1xf32>
    %8 = arith.mulf %6, %7 : vector<128x1xf32>
    %9 = vector.broadcast %8 : vector<128x1xf32> to vector<128x128xf32>
    %10 = arith.mulf %0, %9 : vector<128x128xf32>
    %11 = arith.truncf %10 : vector<128x128xf32> to vector<128x128xbf16>
    %c0_3 = arith.constant 0 : index
    %c0_4 = arith.constant 0 : index
    %12 = vector.load %arg2[%c0_3, %c0_4] : memref<128x512xbf16, #tpu.memory_space<vmem>>, vector<128x512xbf16>
    %cst_5 = arith.constant dense<0.000000e+00> : vector<128x512xf32>
    %13 = tpu.matmul %11, %12, %cst_5 {dimension_numbers = #tpu.dot_dimension_numbers<[1], [0], [0], [1], [0, 0, 1, 1], [], []>} : vector<128x128xbf16>, vector<128x512xbf16>, vector<128x512xf32> -> vector<128x512xf32>
    %c0_6 = arith.constant 0 : index
    %c0_7 = arith.constant 0 : index
    %14 = vector.load %arg4[%c0_6, %c0_7] : memref<1x512xf32, #tpu.memory_space<vmem>>, vector<1x512xf32>
    %15 = vector.broadcast %14 : vector<1x512xf32> to vector<128x512xf32>
    %16 = arith.addf %13, %15 : vector<128x512xf32>
    %c0_8 = arith.constant 0 : index
    %c0_9 = arith.constant 0 : index
    %17 = vector.load %arg3[%c0_8, %c0_9] : memref<128x512xbf16, #tpu.memory_space<vmem>>, vector<128x512xbf16>
    %18 = arith.extf %17 : vector<128x512xbf16> to vector<128x512xf32>
    %cst_10 = arith.constant 0.000000e+00 : f32
    %19 = vector.broadcast %cst_10 : f32 to vector<128x1xf32>
    %20 = vector.extract_strided_slice %16 {offsets = [0, 0], sizes = [128, 256], strides = [1, 1]} : vector<128x512xf32> to vector<128x256xf32>
    %cst_11 = arith.constant dense<0xFF800000> : vector<128xf32>
    %21 = vector.multi_reduction <maximumf>, %20, %cst_11 [1] : vector<128x256xf32> to vector<128xf32>
    %22 = vector.shape_cast %21 : vector<128xf32> to vector<128x1xf32>
    %23 = vector.broadcast %22 : vector<128x1xf32> to vector<128x256xf32>
    %24 = arith.subf %20, %23 : vector<128x256xf32>
    %25 = math.exp %24 : vector<128x256xf32>
    %cst_12 = arith.constant dense<0.000000e+00> : vector<128xf32>
    %26 = vector.multi_reduction <add>, %25, %cst_12 [1] : vector<128x256xf32> to vector<128xf32>
    %27 = vector.shape_cast %26 : vector<128xf32> to vector<128x1xf32>
    %28 = math.log %27 : vector<128x1xf32>
    %29 = arith.addf %22, %28 : vector<128x1xf32>
    %30 = vector.extract_strided_slice %18 {offsets = [0, 0], sizes = [128, 256], strides = [1, 1]} : vector<128x512xf32> to vector<128x256xf32>
    %cst_13 = arith.constant dense<0.000000e+00> : vector<128xf32>
    %31 = vector.multi_reduction <add>, %30, %cst_13 [1] : vector<128x256xf32> to vector<128xf32>
    %32 = vector.shape_cast %31 : vector<128xf32> to vector<128x1xf32>
    %33 = arith.mulf %32, %29 : vector<128x1xf32>
    %34 = arith.mulf %30, %20 : vector<128x256xf32>
    %cst_14 = arith.constant dense<0.000000e+00> : vector<128xf32>
    %35 = vector.multi_reduction <add>, %34, %cst_14 [1] : vector<128x256xf32> to vector<128xf32>
    %36 = vector.shape_cast %35 : vector<128xf32> to vector<128x1xf32>
    %37 = arith.subf %33, %36 : vector<128x1xf32>
    %38 = arith.addf %19, %37 : vector<128x1xf32>
    %39 = vector.extract_strided_slice %16 {offsets = [0, 256], sizes = [128, 128], strides = [1, 1]} : vector<128x512xf32> to vector<128x128xf32>
    %cst_15 = arith.constant dense<0xFF800000> : vector<128xf32>
    %40 = vector.multi_reduction <maximumf>, %39, %cst_15 [1] : vector<128x128xf32> to vector<128xf32>
    %41 = vector.shape_cast %40 : vector<128xf32> to vector<128x1xf32>
    %42 = vector.broadcast %41 : vector<128x1xf32> to vector<128x128xf32>
    %43 = arith.subf %39, %42 : vector<128x128xf32>
    %44 = math.exp %43 : vector<128x128xf32>
    %cst_16 = arith.constant dense<0.000000e+00> : vector<128xf32>
    %45 = vector.multi_reduction <add>, %44, %cst_16 [1] : vector<128x128xf32> to vector<128xf32>
    %46 = vector.shape_cast %45 : vector<128xf32> to vector<128x1xf32>
    %47 = math.log %46 : vector<128x1xf32>
    %48 = arith.addf %41, %47 : vector<128x1xf32>
    %49 = vector.extract_strided_slice %18 {offsets = [0, 256], sizes = [128, 128], strides = [1, 1]} : vector<128x512xf32> to vector<128x128xf32>
    %cst_17 = arith.constant dense<0.000000e+00> : vector<128xf32>
    %50 = vector.multi_reduction <add>, %49, %cst_17 [1] : vector<128x128xf32> to vector<128xf32>
    %51 = vector.shape_cast %50 : vector<128xf32> to vector<128x1xf32>
    %52 = arith.mulf %51, %48 : vector<128x1xf32>
    %53 = arith.mulf %49, %39 : vector<128x128xf32>
    %cst_18 = arith.constant dense<0.000000e+00> : vector<128xf32>
    %54 = vector.multi_reduction <add>, %53, %cst_18 [1] : vector<128x128xf32> to vector<128xf32>
    %55 = vector.shape_cast %54 : vector<128xf32> to vector<128x1xf32>
    %56 = arith.subf %52, %55 : vector<128x1xf32>
    %57 = arith.addf %38, %56 : vector<128x1xf32>
    %58 = vector.extract_strided_slice %16 {offsets = [0, 384], sizes = [128, 128], strides = [1, 1]} : vector<128x512xf32> to vector<128x128xf32>
    %cst_19 = arith.constant dense<0xFF800000> : vector<128xf32>
    %59 = vector.multi_reduction <maximumf>, %58, %cst_19 [1] : vector<128x128xf32> to vector<128xf32>
    %60 = vector.shape_cast %59 : vector<128xf32> to vector<128x1xf32>
    %61 = vector.broadcast %60 : vector<128x1xf32> to vector<128x128xf32>
    %62 = arith.subf %58, %61 : vector<128x128xf32>
    %63 = math.exp %62 : vector<128x128xf32>
    %cst_20 = arith.constant dense<0.000000e+00> : vector<128xf32>
    %64 = vector.multi_reduction <add>, %63, %cst_20 [1] : vector<128x128xf32> to vector<128xf32>
    %65 = vector.shape_cast %64 : vector<128xf32> to vector<128x1xf32>
    %66 = math.log %65 : vector<128x1xf32>
    %67 = arith.addf %60, %66 : vector<128x1xf32>
    %68 = vector.extract_strided_slice %18 {offsets = [0, 384], sizes = [128, 128], strides = [1, 1]} : vector<128x512xf32> to vector<128x128xf32>
    %cst_21 = arith.constant dense<0.000000e+00> : vector<128xf32>
    %69 = vector.multi_reduction <add>, %68, %cst_21 [1] : vector<128x128xf32> to vector<128xf32>
    %70 = vector.shape_cast %69 : vector<128xf32> to vector<128x1xf32>
    %71 = arith.mulf %70, %67 : vector<128x1xf32>
    %72 = arith.mulf %68, %58 : vector<128x128xf32>
    %cst_22 = arith.constant dense<0.000000e+00> : vector<128xf32>
    %73 = vector.multi_reduction <add>, %72, %cst_22 [1] : vector<128x128xf32> to vector<128xf32>
    %74 = vector.shape_cast %73 : vector<128xf32> to vector<128x1xf32>
    %75 = arith.subf %71, %74 : vector<128x1xf32>
    %76 = arith.addf %57, %75 : vector<128x1xf32>
    %cst_23 = arith.constant dense<0.000000e+00> : vector<1xf32>
    %77 = vector.multi_reduction <add>, %76, %cst_23 [0] : vector<128x1xf32> to vector<1xf32>
    %78 = vector.shape_cast %77 : vector<1xf32> to vector<1x1xf32>
    %cst_24 = arith.constant 0.333333343 : f32
    %79 = vector.broadcast %cst_24 : f32 to vector<1x1xf32>
    %80 = arith.mulf %78, %79 : vector<1x1xf32>
    %81 = vector.shape_cast %80 : vector<1x1xf32> to vector<1x1x1xf32>
    %82 = vector.shape_cast %81 : vector<1x1x1xf32> to vector<1x1x1xf32>
    %83 = vector.broadcast %82 : vector<1x1x1xf32> to vector<1x8x128xf32>
    %c0_25 = arith.constant 0 : index
    %c0_26 = arith.constant 0 : index
    %c0_27 = arith.constant 0 : index
    %84 = vector.load %arg5[%c0_25, %c0_26, %c0_27] : memref<1x8x128xf32, #tpu.memory_space<vmem>>, vector<1x8x128xf32>
    tpu.vector_store %arg5[%c0_25, %c0_26, %c0_27], %83 {strides = array<i32>} : memref<1x8x128xf32, #tpu.memory_space<vmem>>, vector<1x8x128xf32>,
    return
  }
  func.func @transform_0(%arg0: i32) -> (i32, i32) {
    %c0_i32 = arith.constant 0 : i32
    %c0_i32_0 = arith.constant 0 : i32
    return %arg0, %c0_i32 : i32, i32
  }
  func.func @transform_1(%arg0: i32) -> (i32, i32) {
    %c0_i32 = arith.constant 0 : i32
    %c0_i32_0 = arith.constant 0 : i32
    %c0_i32_1 = arith.constant 0 : i32
    return %c0_i32, %c0_i32_0 : i32, i32
  }
  func.func @transform_2(%arg0: i32) -> (i32, i32) {
    %c0_i32 = arith.constant 0 : i32
    %c0_i32_0 = arith.constant 0 : i32
    return %arg0, %c0_i32 : i32, i32
  }
  func.func @transform_3(%arg0: i32) -> (i32, i32) {
    %c0_i32 = arith.constant 0 : i32
    %c0_i32_0 = arith.constant 0 : i32
    %c0_i32_1 = arith.constant 0 : i32
    return %c0_i32, %c0_i32_0 : i32, i32
  }
  func.func @transform_4(%arg0: i32) -> (i32, i32, i32) {
    %c0_i32 = arith.constant 0 : i32
    %c0_i32_0 = arith.constant 0 : i32
    %c0_i32_1 = arith.constant 0 : i32
    return %arg0, %c0_i32, %c0_i32_0 : i32, i32, i32
  }
}

</mosaic_0001>

<bundles_post_ra>
// kernel: _forward_impl.1
= control target key start
LH: loop header
LB: loop body
LE: loop exit
PB: predicated region body
PF: predicated region fallthrough
CT: control target
= control target key end

     0   :  { %s2371_s15 = smov 0   ;;  %s4055_s0 = inlined_call_operand.vmem [shape: f32[256,128], index: 0, kind: input, shape index: {}]   ;;  %s4056_s1 = inlined_call_operand.vmem [shape: bf16[128,512], index: 1, kind: input, shape index: {}]   ;;  %s4057_s2 = inlined_call_operand.vmem [shape: bf16[256,512], index: 2, kind: input, shape index: {}]   ;;  %s4058_s3 = inlined_call_operand.vmem [shape: f32[1,512], index: 3, kind: input, shape index: {}]   ;;  %s4059_s4 = inlined_call_operand.vmem [shape: f32[2,8,128], index: 4, kind: output, shape index: {}]  }
   0x1 LB: > { %s2377_s16 = sadd.s32 4294967295, %s2343_s15   ;;  %p1980_p0 = scmp.ge.s32.totalorder %s2343_s15, 1  ;;  %s2343_s15 = sphi %s2371_s15, %s14_s15  }
   0x2   : > { %p175_p1 = scmp.lt.s32.totalorder %s2343_s15, 3 }
   0x4   : > { %p176_p2 = pnand %p1980_p0, %p175_p1 }
   0x6   : > { %179 = sbr.rel (%p176_p2) target bundleno = 950 (0x3b6), region = 36 }
   0xd   : > { %s1981_s17 = sshll.u32 %s2377_s16, 4  ;;  %v2031_v0 = vld [vmem:[%s4056_s1 + $0x4] ss:$16 sps:$4 sm:$0xff]   ;;  %v2033_v1 = vld [vmem:[%s4056_s1 + $0xc] ss:$16 sps:$4 sm:$0xff]   ;;  %p219_p4 = scmp.lt.s32.totalorder %s2377_s16, 1 }
   0xe   : > { %p207_p3 = scmp.lt.s32.totalorder %s1981_s17, 31  ;;  %574 = vmatprep.subr.bf16.mxu0 %v2031_v0  ;;  %v2035_v2 = vld [vmem:[%s4056_s1] ss:$16 sps:$4 sm:$0xff]   ;;  %v2036_v3 = vld [vmem:[%s4056_s1 + $0x8] ss:$16 sps:$4 sm:$0xff]   ;;  %687 = vmatprep.subr.bf16.mxu1 %v2033_v1  ;;  %v2345_v0 = vmov 0  }
   0xf   : > { %v2037_v4 = vld [vmem:[%s4056_s1 + $0x24] ss:$16 sps:$4 sm:$0xff]   ;;  %575 = vmatpush1.bf16.msra.mxu0 %v2035_v2  ;;  %688 = vmatpush1.bf16.msra.mxu1 %v2036_v3  ;;  %v2039_v5 = vld [vmem:[%s4056_s1 + $0x2c] ss:$16 sps:$4 sm:$0xff]   ;;  %v2041_v6 = vld [vmem:[%s4056_s1 + $0x20] ss:$16 sps:$4 sm:$0xff]  }
  0x10   : > { %s4538_s17 = smov (!%p207_p3, %s1981_s17), 31  ;;  %576 = vmatprep.subr.bf16.mxu0 %v2037_v4  ;;  %v2042_v7 = vld [vmem:[%s4056_s1 + $0x28] ss:$16 sps:$4 sm:$0xff]   ;;  %689 = vmatprep.subr.bf16.mxu1 %v2039_v5  ;;  %v2043_v8 = vld [vmem:[%s4056_s1 + $0x44] ss:$16 sps:$4 sm:$0xff]   ;;  %s4540_s16 = smov (!%p219_p4, %s2377_s16), 1 }
  0x11   : > { %s1982_s6 = sshll.u32 %s4538_s17, 3  ;;  %v2045_v19 = vld [vmem:[%s4056_s1 + $0x4c] ss:$16 sps:$4 sm:$0xff]   ;;  %v2047_v30 = vld [vmem:[%s4056_s1 + $0x40] ss:$16 sps:$4 sm:$0xff]   ;;  %606 = vmatprep.mubr.bf16.mxu0 %v2345_v0  ;;  %719 = vmatprep.mubr.bf16.mxu1 %v2345_v0  ;;  %s2021_s18 = sshll.u32 %s4538_s17, 4 }
  0x12   : > { %s2412_s11 = scalar_lea.vmem %s4055_s0, %s1982_s6  ;;  %v2048_v31 = vld [vmem:[%s4056_s1 + $0x48] ss:$16 sps:$4 sm:$0xff]   ;;  %v2049_v34 = vld [vmem:[%s4056_s1 + $0x64] ss:$16 sps:$4 sm:$0xff]   ;;  %v2051_v35 = vld [vmem:[%s4056_s1 + $0x6c] ss:$16 sps:$4 sm:$0xff]  }
  0x13   : > { %v2418_v9 = vld [vmem:[%s2412_s11] sm:$0xff]  ;;  %v2421_v10 = vld [vmem:[%s2412_s11 + $0x8] sm:$0xff]  ;;  %v2424_v11 = vld [vmem:[%s2412_s11 + $0x10] sm:$0xff]  ;;  %577 = vmatpush1.bf16.msra.mxu0 %v2041_v6  ;;  %690 = vmatpush1.bf16.msra.mxu1 %v2042_v7  ;;  %s1986_s22 = sshll.u32 %s4540_s16, 3 }
  0x14   : > { %v240_v12 = vmul.f32 %v2418_v9, %v2418_v9  ;;  %v242_v13 = vmul.f32 %v2424_v11, %v2424_v11  ;;  %v2431_v14 = vld [vmem:[%s2412_s11 + $0x18] sm:$0xff]  ;;  %578 = vmatprep.subr.bf16.mxu0 %v2043_v8  ;;  %v241_v15 = vmul.f32 %v2421_v10, %v2421_v10  ;;  %v2438_v17 = vld [vmem:[%s2412_s11 + $0x28] sm:$0xff]  ;;  %v2441_v18 = vld [vmem:[%s2412_s11 + $0x20] sm:$0xff]  ;;  %691 = vmatprep.subr.bf16.mxu1 %v2045_v19  ;;  %s222_s25 = scalar_lea.vmem %s4059_s4, %s1986_s22 }
  0x15   : > { %v243_v16 = vmul.f32 %v2431_v14, %v2431_v14  ;;  %v2447_v20 = vld [vmem:[%s2412_s11 + $0x38] sm:$0xff]  ;;  %v2450_v21 = vld [vmem:[%s2412_s11 + $0x30] sm:$0xff]  ;;  %v245_v22 = vmul.f32 %v2438_v17, %v2438_v17  ;;  %v244_v23 = vmul.f32 %v2441_v18, %v2441_v18  ;;  %v2461_v26 = vld [vmem:[%s2412_s11 + $0x48] sm:$0xff] }
  0x16   : > { %256 = vadd.xlane.f32.xlu0 %v240_v12  ;;  %260 = vadd.xlane.f32.xlu1 %v242_v13  ;;  %v247_v24 = vmul.f32 %v2447_v20, %v2447_v20  ;;  %v246_v25 = vmul.f32 %v2450_v21, %v2450_v21  ;;  %v2464_v27 = vld [vmem:[%s2412_s11 + $0x40] sm:$0xff]  ;;  %v249_v28 = vmul.f32 %v2461_v26, %v2461_v26  ;;  %v2477_v32 = vld [vmem:[%s2412_s11 + $0x58] sm:$0xff]  ;;  %v2480_v33 = vld [vmem:[%s2412_s11 + $0x50] sm:$0xff] }
  0x17   : > { %v248_v29 = vmul.f32 %v2464_v27, %v2464_v27  ;;  %579 = vmatpush1.bf16.msra.mxu0 %v2047_v30  ;;  %692 = vmatpush1.bf16.msra.mxu1 %v2048_v31  ;;  %v251_v36 = vmul.f32 %v2477_v32, %v2477_v32  ;;  %v250_v37 = vmul.f32 %v2480_v33, %v2480_v33  ;;  %v2053_v38 = vld [vmem:[%s4056_s1 + $0x60] ss:$16 sps:$4 sm:$0xff]   ;;  %v2054_v39 = vld [vmem:[%s4056_s1 + $0x68] ss:$16 sps:$4 sm:$0xff]   ;;  %v2055_v42 = vld [vmem:[%s4056_s1 + $0x84] ss:$16 sps:$4 sm:$0xff]  }
  0x18   : > { %v2499_v40 = vld [vmem:[%s2412_s11 + $0x68] sm:$0xff]  ;;  %v2502_v41 = vld [vmem:[%s2412_s11 + $0x60] sm:$0xff]  ;;  %580 = vmatprep.subr.bf16.mxu0 %v2049_v34  ;;  %693 = vmatprep.subr.bf16.mxu1 %v2051_v35  ;;  %v2521_v48 = vld [vmem:[%s2412_s11 + $0x78] sm:$0xff] }
  0x19   : > { %v2057_v43 = vld [vmem:[%s4056_s1 + $0x8c] ss:$16 sps:$4 sm:$0xff]   ;;  %v253_v44 = vmul.f32 %v2499_v40, %v2499_v40  ;;  %v252_v45 = vmul.f32 %v2502_v41, %v2502_v41  ;;  %v2059_v46 = vld [vmem:[%s4056_s1 + $0x80] ss:$16 sps:$4 sm:$0xff]   ;;  %v2060_v47 = vld [vmem:[%s4056_s1 + $0x88] ss:$16 sps:$4 sm:$0xff]   ;;  %v255_v52 = vmul.f32 %v2521_v48, %v2521_v48 }
  0x1a   : > { %258 = vadd.xlane.f32.xlu0 %v241_v15  ;;  %262 = vadd.xlane.f32.xlu1 %v243_v16  ;;  %v2524_v49 = vld [vmem:[%s2412_s11 + $0x70] sm:$0xff]  ;;  %v2063_v51 = vld [vmem:[%s4056_s1 + $0xac] ss:$16 sps:$4 sm:$0xff]   ;;  %v2066_v55 = vld [vmem:[%s4056_s1 + $0xa8] ss:$16 sps:$4 sm:$0xff]   ;;  %s2572_s11 = scalar_lea.vmem %s4057_s2, %s2021_s18 }
  0x1b   : > { %581 = vmatpush1.bf16.msra.mxu0 %v2053_v38  ;;  %694 = vmatpush1.bf16.msra.mxu1 %v2054_v39  ;;  %v2061_v50 = vld [vmem:[%s4056_s1 + $0xa4] ss:$16 sps:$4 sm:$0xff]   ;;  %v254_v53 = vmul.f32 %v2524_v49, %v2524_v49  ;;  %v2065_v54 = vld [vmem:[%s4056_s1 + $0xa0] ss:$16 sps:$4 sm:$0xff]   ;;  %v2069_v57 = vld [vmem:[%s4056_s1 + $0xcc] ss:$16 sps:$4 sm:$0xff]  }
  0x1c   : > { %582 = vmatprep.subr.bf16.mxu0 %v2055_v42  ;;  %695 = vmatprep.subr.bf16.mxu1 %v2057_v43  ;;  %v2067_v56 = vld [vmem:[%s4056_s1 + $0xc4] ss:$16 sps:$4 sm:$0xff]   ;;  %v2071_v58 = vld [vmem:[%s4056_s1 + $0xc0] ss:$16 sps:$4 sm:$0xff]   ;;  %v2072_v59 = vld [vmem:[%s4056_s1 + $0xc8] ss:$16 sps:$4 sm:$0xff]  }
  0x1d   : > { %v2073_v60 = vld [vmem:[%s4056_s1 + $0xe4] ss:$16 sps:$4 sm:$0xff]   ;;  %v2075_v61 = vld [vmem:[%s4056_s1 + $0xec] ss:$16 sps:$4 sm:$0xff]   ;;  %v2077_v62 = vld [vmem:[%s4056_s1 + $0xe0] ss:$16 sps:$4 sm:$0xff]  }
  0x1e   : > { %266 = vadd.xlane.f32.xlu1 %v245_v22  ;;  %264 = vadd.xlane.f32.xlu0 %v244_v23  ;;  %v2078_v63 = vld [vmem:[%s4056_s1 + $0xe8] ss:$16 sps:$4 sm:$0xff]   ;;  %v2575_v1 = vld [vmem:[%s2572_s11] sm:$0xff]  ;;  %v2633_v42 = vld [vmem:[%s2572_s11 + $0x30] sm:$0xff] }
  0x1f   : > { %583 = vmatpush1.bf16.msra.mxu0 %v2059_v46  ;;  %696 = vmatpush1.bf16.msra.mxu1 %v2060_v47  ;;  %v2578_v2 = vld [vmem:[%s2572_s11 + $0x20] sm:$0xff]  ;;  %v4106_v3 = vunpack.c.l.bf16 %v2575_v1  ;;  %v4105_v4 = vunpack.c.h.bf16 %v2575_v1  ;;  %v4089_v43 = vunpack.c.l.bf16 %v2633_v42 }
  0x20   : > { %584 = vmatprep.subr.bf16.mxu0 %v2061_v50  ;;  %697 = vmatprep.subr.bf16.mxu1 %v2063_v51  ;;  %v4093_v5 = vunpack.c.l.bf16 %v2578_v2  ;;  %v4092_v6 = vunpack.c.h.bf16 %v2578_v2  ;;  %v2585_v7 = vld [vmem:[%s2572_s11 + $0x40] sm:$0xff] }
  0x21   : > { %v1136_v8 = vadd.f32 %v4105_v4, %v4106_v3  ;;  %v4087_v13 = vunpack.c.l.bf16 %v2585_v7  ;;  %v4086_v15 = vunpack.c.h.bf16 %v2585_v7  ;;  %v2598_v16 = vld [vmem:[%s2572_s11 + $0x60] sm:$0xff] }
  0x22   : > { %270 = vadd.xlane.f32.xlu1 %v247_v24  ;;  %268 = vadd.xlane.f32.xlu0 %v246_v25  ;;  %v1142_v12 = vadd.f32 %v4092_v6, %v4093_v5  ;;  %v4084_v22 = vunpack.c.l.bf16 %v2598_v16  ;;  %v4083_v23 = vunpack.c.h.bf16 %v2598_v16  ;;  %v2607_v24 = vld [vmem:[%s2572_s11 + $0x80] sm:$0xff] }
  0x23   : > { %585 = vmatpush1.bf16.msra.mxu0 %v2065_v54  ;;  %698 = vmatpush1.bf16.msra.mxu1 %v2066_v55  ;;  %v1148_v19 = vadd.f32 %v4086_v15, %v4087_v13  ;;  %v2616_v30 = vld [vmem:[%s2572_s11 + $0xa0] sm:$0xff] }
  0x24   : > { %586 = vmatprep.subr.bf16.mxu0 %v2067_v56  ;;  %699 = vmatprep.subr.bf16.mxu1 %v2069_v57  ;;  %v1154_v25 = vadd.f32 %v4083_v23, %v4084_v22  ;;  %v4071_v34 = vunpack.c.l.bf16 %v2616_v30  ;;  %v4070_v35 = vunpack.c.h.bf16 %v2616_v30  ;;  %v2660_v56 = vld [vmem:[%s2572_s11 + $0x70] sm:$0xff]  ;;  %v2781_v23 = vld [vmem:[%s2572_s11 + $0x98] sm:$0xff] }
  0x26   : > { %274 = vadd.xlane.f32.xlu1 %v249_v28  ;;  %272 = vadd.xlane.f32.xlu0 %v248_v29  ;;  %v4075_v28 = vunpack.c.l.bf16 %v2607_v24  ;;  %v4074_v29 = vunpack.c.h.bf16 %v2607_v24  ;;  %v1166_v47 = vadd.f32 %v4070_v35, %v4071_v34  ;;  %v2737_v34 = vld [vmem:[%s2572_s11 + $0x88] sm:$0xff] }
  0x27   : > { %587 = vmatpush1.bf16.msra.mxu0 %v2071_v58  ;;  %700 = vmatpush1.bf16.msra.mxu1 %v2072_v59 }
  0x28   : > { %588 = vmatprep.subr.bf16.mxu0 %v2073_v60  ;;  %701 = vmatprep.subr.bf16.mxu1 %v2075_v61  ;;  %v1160_v31 = vadd.f32 %v4074_v29, %v4075_v28  ;;  %v4067_v61 = vunpack.c.l.bf16 %v2660_v56  ;;  %v2750_v29 = vld [vmem:[%s2572_s11 + $0xa8] sm:$0xff] }
  0x29   : > { %4192 = vst [vmem:[#allocation5_spill] sm:$0xff] %v2750_v29 }
  0x2a   : > { %278 = vadd.xlane.f32.xlu1 %v251_v36  ;;  %276 = vadd.xlane.f32.xlu0 %v250_v37  ;;  %v2625_v36 = vld [vmem:[%s2572_s11 + $0x10] sm:$0xff]  ;;  %v2628_v37 = vld [vmem:[%s2572_s11 + $0xc0] sm:$0xff] }
  0x2b   : > { %589 = vmatpush1.bf16.msra.mxu0 %v2077_v62  ;;  %702 = vmatpush1.bf16.msra.mxu1 %v2078_v63  ;;  %v4103_v38 = vunpack.c.l.bf16 %v2625_v36  ;;  %v4101_v39 = vunpack.c.h.bf16 %v2625_v36  ;;  %v4065_v50 = vunpack.c.l.bf16 %v2628_v37  ;;  %v4062_v51 = vunpack.c.h.bf16 %v2628_v37  ;;  %v2675_v63 = vld [vmem:[%s2572_s11 + $0x90] sm:$0xff] }
  0x2c   : > { %v4066_v62 = vunpack.c.h.bf16 %v2660_v56 }
  0x2d   : > { %v1139_v46 = vadd.f32 %v4101_v39, %v4103_v38  ;;  %v1172_v57 = vadd.f32 %v4062_v51, %v4065_v50  ;;  %v2710_v51 = vld [vmem:[%s2572_s11 + $0x48] sm:$0xff]  ;;  %v2719_v50 = vld [vmem:[%s2572_s11 + $0xf0] sm:$0xff] }
  0x2e   : > { %282 = vadd.xlane.f32.xlu1 %v253_v44  ;;  %280 = vadd.xlane.f32.xlu0 %v252_v45  ;;  %v4088_v44 = vunpack.c.h.bf16 %v2633_v42  ;;  %v2638_v45 = vld [vmem:[%s2572_s11 + $0x50] sm:$0xff]  ;;  %4191 = vst [vmem:[#allocation4_spill] sm:$0xff] %v2719_v50  ;;  %v4096_v13 = vunpack.c.h.bf16 %v2710_v51 }
  0x2f   : > { %v4081_v54 = vunpack.c.l.bf16 %v2638_v45  ;;  %v4080_v55 = vunpack.c.h.bf16 %v2638_v45 }
  0x31   : > { %v1151_v60 = vadd.f32 %v4080_v55, %v4081_v54  ;;  %v2775_v54 = vld [vmem:[%s2572_s11 + $0x78] sm:$0xff] }
  0x32   : > { %286 = vadd.xlane.f32.xlu1 %v255_v52  ;;  %284 = vadd.xlane.f32.xlu0 %v254_v53  ;;  %v2651_v52 = vld [vmem:[%s2572_s11 + $0xe0] sm:$0xff]  ;;  %v1145_v53 = vadd.f32 %v4088_v44, %v4089_v43  ;;  %v4098_v43 = vunpack.c.l.bf16 %v2781_v23 }
  0x33   : > { %v4061_v58 = vunpack.c.l.bf16 %v2651_v52  ;;  %v4060_v59 = vunpack.c.h.bf16 %v2651_v52 }
  0x36   : > { %1137 = vadd.xlane.f32.xlu0 %v1136_v8  ;;  %1140 = vadd.xlane.f32.xlu1 %v1139_v46  ;;  %v1178_v8 = vadd.f32 %v4060_v59, %v4061_v58  ;;  %v2691_v46 = vld [vmem:[%s2572_s11 + $0xb0] sm:$0xff] }
  0x37   : > { %4189 = vst [vmem:[#allocation2_spill] sm:$0xff] %v2691_v46  ;;  %v4068_v59 = vunpack.c.h.bf16 %v2691_v46  ;;  %v2704_v58 = vld [vmem:[%s2572_s11 + $0xd0] sm:$0xff] }
  0x38   : > { %4190 = vst [vmem:[#allocation3_spill] sm:$0xff] %v2704_v58 }
  0x3a   : > { %1143 = vadd.xlane.f32.xlu0 %v1142_v12  ;;  %1146 = vadd.xlane.f32.xlu1 %v1145_v53  ;;  %v2682_v12 = vld [vmem:[%s2572_s11 + $0x8] sm:$0xff] }
  0x3b   : > { %v2695_v53 = vld [vmem:[%s2572_s11 + $0x28] sm:$0xff] }
  0x3e   : > { %1149 = vadd.xlane.f32.xlu0 %v1148_v19  ;;  %1152 = vadd.xlane.f32.xlu1 %v1151_v60  ;;  %v1157_v19 = vadd.f32 %v4066_v62, %v4067_v61  ;;  %v4069_v60 = vunpack.c.l.bf16 %v2691_v46  ;;  %v4085_v62 = vunpack.c.l.bf16 %v2710_v51  ;;  %v2725_v61 = vld [vmem:[%s2572_s11 + $0x68] sm:$0xff] }
  0x3f   : > { %v4078_v35 = vunpack.c.l.bf16 %v2725_v61 }
  0x42   : > { %1155 = vadd.xlane.f32.xlu0 %v1154_v25  ;;  %v4064_v25 = vunpack.c.l.bf16 %v2675_v63  ;;  %1158 = vadd.xlane.f32.xlu1 %v1157_v19  ;;  %v1169_v19 = vadd.f32 %v4068_v59, %v4069_v60  ;;  %v4077_v59 = vunpack.c.l.bf16 %v2719_v50  ;;  %v4076_v60 = vunpack.c.h.bf16 %v2719_v50 }
  0x46   : > { %1161 = vadd.xlane.f32.xlu0 %v1160_v31  ;;  %v4063_v31 = vunpack.c.h.bf16 %v2675_v63 }
  0x4a   : > { %1167 = vadd.xlane.f32.xlu0 %v1166_v47  ;;  %v834_v47 = vunpack.c.l.bf16 %v2682_v12 }
  0x4e   : > { %1173 = vadd.xlane.f32.xlu0 %v1172_v57  ;;  %v1163_v57 = vadd.f32 %v4063_v31, %v4064_v25  ;;  %v4073_v31 = vunpack.c.l.bf16 %v2704_v58  ;;  %v4072_v25 = vunpack.c.h.bf16 %v2704_v58 }
  0x50   : > { %1164 = vadd.xlane.f32.xlu1 %v1163_v57  ;;  %v1175_v57 = vadd.f32 %v4072_v25, %v4073_v31  ;;  %v4079_v25 = vunpack.c.l.bf16 %v2737_v34  ;;  %v2747_v31 = vld [vmem:[%s2572_s11 + $0x18] sm:$0xff] }
  0x51   : > { %v4108_v28 = vunpack.c.l.bf16 %v2747_v31 }
  0x52   : > { %1179 = vadd.xlane.f32.xlu0 %v1178_v8  ;;  %v4094_v8 = vunpack.c.l.bf16 %v2695_v53 }
  0x54   : > { %1170 = vadd.xlane.f32.xlu1 %v1169_v19  ;;  %v1181_v19 = vadd.f32 %v4076_v60, %v4077_v59  ;;  %v2757_v60 = vld [vmem:[%s2572_s11 + $0x38] sm:$0xff] }
  0x55   : > { %v4091_v59 = vunpack.c.l.bf16 %v2757_v60  ;;  %v4097_v55 = vunpack.c.h.bf16 %v2757_v60 }
  0x56   : > { %1472 = vadd.xlane.f32.xlu0 %v834_v47 }
  0x58   : > { %1176 = vadd.xlane.f32.xlu1 %v1175_v57  ;;  %v4082_v57 = vunpack.c.l.bf16 %v2750_v29 }
  0x5a   : > { %1476 = vadd.xlane.f32.xlu0 %v4094_v8  ;;  %v2793_v8 = vld [vmem:[%s2572_s11 + $0xb8] sm:$0xff] }
  0x5b   : > { %4193 = vst [vmem:[#allocation6_spill] sm:$0xff] %v2793_v8 }
  0x5c   : > { %1182 = vadd.xlane.f32.xlu1 %v1181_v19  ;;  %v4104_v19 = vunpack.c.h.bf16 %v2747_v31 }
  0x5e   : > { %1480 = vadd.xlane.f32.xlu0 %v4085_v62 }
  0x60   : > { %1474 = vadd.xlane.f32.xlu1 %v4108_v28  ;;  %v4115_v28 = vunpack.c.h.bf16 %v2750_v29 }
  0x62   : > { %1484 = vadd.xlane.f32.xlu0 %v4078_v35  ;;  %v2766_v35 = vld [vmem:[%s2572_s11 + $0x58] sm:$0xff] }
  0x64   : > { %1478 = vadd.xlane.f32.xlu1 %v4091_v59 }
  0x66   : > { %1488 = vadd.xlane.f32.xlu0 %v4079_v25  ;;  %v4090_v25 = vunpack.c.l.bf16 %v2766_v35 }
  0x68   : > { %1482 = vadd.xlane.f32.xlu1 %v4090_v25 }
  0x6a   : > { %1492 = vadd.xlane.f32.xlu0 %v4082_v57  ;;  %v4095_v57 = vunpack.c.l.bf16 %v2775_v54 }
  0x6c   : > { %1486 = vadd.xlane.f32.xlu1 %v4095_v57 }
  0x6e   : > { %1762 = vadd.xlane.f32.xlu0 %v4104_v19 }
  0x70   : > { %1490 = vadd.xlane.f32.xlu1 %v4098_v43 }
  0x72   : > { %1766 = vadd.xlane.f32.xlu0 %v4097_v55 }
  0x76   : > { %1768 = vadd.xlane.f32.xlu0 %v4096_v13 }
  0xa3   : > { %v257_v22 = vpop.xlane.xlu0 %256  ;;  %v261_v62 = vpop.xlane.xlu1 %260 }
  0xa4   : > { %v288_v15 = vmax.f32 %v257_v22, 1e-24  ;;  %v290_v44 = vmax.f32 %v261_v62, 1e-24  ;;  %v4099_v22 = vunpack.c.h.bf16 %v2766_v35  ;;  %v4100_v62 = vunpack.c.l.bf16 %v2793_v8 }
  0xa6   : > { %2079 = vrsqrt.f32 %v288_v15  ;;  %1770 = vadd.xlane.f32.xlu0 %v4099_v22  ;;  %1494 = vadd.xlane.f32.xlu1 %v4100_v62 }
  0xa7   : > { %v259_v25 = vpop.xlane.xlu0 %258  ;;  %v263_v59 = vpop.xlane.xlu1 %262  ;;  %2081 = vrsqrt.f32 %v290_v44  ;;  %v4109_v44 = vunpack.c.h.bf16 %v2682_v12 }
  0xa8   : > { %v289_v6 = vmax.f32 %v259_v25, 1e-24  ;;  %v291_v5 = vmax.f32 %v263_v59, 1e-24  ;;  %v4102_v59 = vunpack.c.h.bf16 %v2725_v61 }
  0xaa   : > { %2083 = vrsqrt.f32 %v289_v6  ;;  %1772 = vadd.xlane.f32.xlu0 %v4102_v59  ;;  %1760 = vadd.xlane.f32.xlu1 %v4109_v44  ;;  %v4118_v6 = vunpack.c.h.bf16 %v2695_v53 }
  0xab   : > { %2085 = vrsqrt.f32 %v291_v5  ;;  %v267_v15 = vpop.xlane.xlu1 %266  ;;  %v265_v57 = vpop.xlane.xlu0 %264  ;;  %v4107_v5 = vunpack.c.h.bf16 %v2775_v54 }
  0xac   : > { %v293_v25 = vmax.f32 %v267_v15, 1e-24  ;;  %v292_v13 = vmax.f32 %v265_v57, 1e-24  ;;  %v4117_v57 = vunpack.c.h.bf16 %v2737_v34 }
  0xae   : > { %2087 = vrsqrt.f32 %v293_v25  ;;  %1774 = vadd.xlane.f32.xlu0 %v4107_v5  ;;  %1764 = vadd.xlane.f32.xlu1 %v4118_v6 }
  0xaf   : > { %2089 = vrsqrt.f32 %v292_v13  ;;  %v271_v15 = vpop.xlane.xlu1 %270  ;;  %v269_v62 = vpop.xlane.xlu0 %268 }
  0xb0   : > { %v2080_v55 = vpop.eup %2079  ;;  %v295_v25 = vmax.f32 %v271_v15, 1e-24  ;;  %v294_v19 = vmax.f32 %v269_v62, 1e-24  ;;  %v2821_v15 = vld [vmem:[%s2572_s11 + $0xc8] sm:$0xff] }
  0xb1   : > { %v2082_v43 = vpop.eup %2081  ;;  %v320_v22 = vmul.f32 20.0, %v2080_v55  ;;  %4194 = vst [vmem:[#allocation7_spill] sm:$0xff] %v2821_v15 }
  0xb2   : > { %v322_v4 = vmul.f32 20.0, %v2082_v43  ;;  %1776 = vadd.xlane.f32.xlu0 %v4117_v57  ;;  %2091 = vrsqrt.f32 %v295_v25  ;;  %v4212_v57 = vunpack.c.h.bf16 %v2682_v12 }
  0xb3   : > { %v336_v3 = vmul.f32 %v320_v22, %v2418_v9  ;;  %2093 = vrsqrt.f32 %v294_v19  ;;  %v273_v22 = vpop.xlane.xlu0 %272 }
  0xb4   : > { %v2084_v39 = vpop.eup %2083  ;;  %v338_v43 = vmul.f32 %v322_v4, %v2424_v11  ;;  %v296_v19 = vmax.f32 %v273_v22, 1e-24  ;;  %v4114_v11 = vunpack.c.h.bf16 %v2793_v8  ;;  %v2834_v4 = vld [vmem:[%s2572_s11 + $0xd8] sm:$0xff] }
  0xb5   : > { %v2086_v59 = vpop.eup %2085  ;;  %v321_v38 = vmul.f32 20.0, %v2084_v39  ;;  %v275_v39 = vpop.xlane.xlu1 %274  ;;  %4195 = vst [vmem:[#allocation8_spill] sm:$0xff] %v2834_v4 }
  0xb6   : > { %v323_v13 = vmul.f32 20.0, %v2086_v59  ;;  %1780 = vadd.xlane.f32.xlu0 %v4115_v28 }
  0xb7   : > { %v337_v55 = vmul.f32 %v321_v38, %v2421_v10  ;;  %v4113_v38 = vunpack.c.l.bf16 %v2821_v15 }
  0xb8   : > { %v2088_v44 = vpop.eup %2087  ;;  %v339_v9 = vmul.f32 %v323_v13, %v2431_v14 }
  0xb9   : > { %v352_v5 = vpack.c.bf16 %v337_v55, %v336_v3  ;;  %v2090_v10 = vpop.eup %2089  ;;  %v297_v3 = vmax.f32 %v275_v39, 1e-24  ;;  %v325_v59 = vmul.f32 20.0, %v2088_v44  ;;  %v279_v14 = vpop.xlane.xlu1 %278 }
  0xba   : > { %v353_v62 = vpack.c.bf16 %v339_v9, %v338_v43  ;;  %1496 = vadd.xlane.f32.xlu0 %v4113_v38  ;;  %v277_v39 = vpop.xlane.xlu0 %276  ;;  %v299_v43 = vmax.f32 %v279_v14, 1e-24  ;;  %v4112_v9 = vunpack.c.l.bf16 %v2834_v4 }
  0xbb   : > { %607 = vmatmul.mubr.bf16.vlgmr.msra.gmra.mrb[0].mxu0 %v352_v5  ;;  %720 = vmatmul.mubr.bf16.vlgmr.msra.gmra.mrb[0].mxu1 %v352_v5  ;;  %v324_v5 = vmul.f32 20.0, %v2090_v10  ;;  %2095 = vrsqrt.f32 %v297_v3  ;;  %v341_v55 = vmul.f32 %v325_v59, %v2438_v17  ;;  %v298_v22 = vmax.f32 %v277_v39, 1e-24 }
  0xbc   : > { %616 = vmatprep.mubr.bf16.mxu0 %v2345_v0  ;;  %729 = vmatprep.mubr.bf16.mxu1 %v2345_v0  ;;  %2097 = vrsqrt.f32 %v296_v19  ;;  %v2092_v25 = vpop.eup %2091  ;;  %v4110_v17 = vunpack.c.h.bf16 %v2821_v15 }
  0xbd   : > { %v340_v13 = vmul.f32 %v324_v5, %v2441_v18  ;;  %v2094_v44 = vpop.eup %2093  ;;  %v327_v10 = vmul.f32 20.0, %v2092_v25  ;;  %2099 = vrsqrt.f32 %v299_v43  ;;  %v283_v18 = vpop.xlane.xlu1 %282 }
  0xbe   : > { %1782 = vadd.xlane.f32.xlu0 %v4114_v11  ;;  %v326_v3 = vmul.f32 20.0, %v2094_v44  ;;  %2101 = vrsqrt.f32 %v298_v22  ;;  %v281_v25 = vpop.xlane.xlu0 %280 }
  0xbf   : > { %v354_v19 = vpack.c.bf16 %v341_v55, %v340_v13  ;;  %v343_v14 = vmul.f32 %v327_v10, %v2447_v20  ;;  %v301_v13 = vmax.f32 %v283_v18, 1e-24  ;;  %v300_v44 = vmax.f32 %v281_v25, 1e-24 }
  0xc0   : > { %v342_v5 = vmul.f32 %v326_v3, %v2450_v21 }
  0xc1   : > { %2103 = vrsqrt.f32 %v301_v13  ;;  %v287_v20 = vpop.xlane.xlu1 %286 }
  0xc2   : > { %1498 = vadd.xlane.f32.xlu0 %v4112_v9  ;;  %2105 = vrsqrt.f32 %v300_v44  ;;  %v285_v18 = vpop.xlane.xlu0 %284 }
  0xc3   : > { %617 = vmatmul.mubr.bf16.gmra.mrb[4].mxu0 %v353_v62  ;;  %730 = vmatmul.mubr.bf16.gmra.mrb[4].mxu1 %v353_v62  ;;  %v2847_v62 = vld [vmem:[%s2572_s11 + $0xe8] sm:$0xff] }
  0xc4   : > { %739 = vmatprep.mubr.bf16.mxu1 %v2345_v0  ;;  %626 = vmatprep.mubr.bf16.mxu0 %v2345_v0  ;;  %4196 = vst [vmem:[#allocation9_spill] sm:$0xff] %v2847_v62  ;;  %v4111_v55 = vunpack.c.l.bf16 %v2847_v62 }
  0xc5   : > { %v2096_v59 = vpop.eup %2095 }
  0xc6   : > { %v2098_v39 = vpop.eup %2097  ;;  %1784 = vadd.xlane.f32.xlu0 %v4110_v17  ;;  %v329_v43 = vmul.f32 20.0, %v2096_v59  ;;  %v303_v59 = vmax.f32 %v287_v20, 1e-24 }
  0xc7   : > { %v328_v22 = vmul.f32 20.0, %v2098_v39  ;;  %v2100_v21 = vpop.eup %2099 }
  0xc8   : > { %v345_v3 = vmul.f32 %v329_v43, %v2461_v26  ;;  %v2102_v17 = vpop.eup %2101  ;;  %v331_v25 = vmul.f32 20.0, %v2100_v21  ;;  %2107 = vrsqrt.f32 %v303_v59 }
  0xc9   : > { %v344_v10 = vmul.f32 %v328_v22, %v2464_v27  ;;  %v330_v39 = vmul.f32 20.0, %v2102_v17 }
  0xca   : > { %1500 = vadd.xlane.f32.xlu0 %v4111_v55  ;;  %v347_v26 = vmul.f32 %v331_v25, %v2477_v32 }
  0xcb   : > { %740 = vmatmul.mubr.bf16.gmra.mrb[8].mxu1 %v354_v19  ;;  %627 = vmatmul.mubr.bf16.gmra.mrb[8].mxu0 %v354_v19  ;;  %v355_v19 = vpack.c.bf16 %v343_v14, %v342_v5  ;;  %v302_v5 = vmax.f32 %v285_v18, 1e-24  ;;  %v356_v14 = vpack.c.bf16 %v345_v3, %v344_v10  ;;  %v2104_v13 = vpop.eup %2103  ;;  %v346_v27 = vmul.f32 %v330_v39, %v2480_v33 }
  0xcc   : > { %749 = vmatprep.mubr.bf16.mxu1 %v2345_v0  ;;  %636 = vmatprep.mubr.bf16.mxu0 %v2345_v0  ;;  %v2106_v44 = vpop.eup %2105  ;;  %v333_v43 = vmul.f32 20.0, %v2104_v13 }
  0xcd   : > { %2109 = vrsqrt.f32 %v302_v5  ;;  %v332_v22 = vmul.f32 20.0, %v2106_v44  ;;  %v2877_v5 = vpop.xlane.xlu0 %1137 }
  0xce   : > { %v349_v21 = vmul.f32 %v333_v43, %v2499_v40  ;;  %v4116_v40 = vunpack.c.h.bf16 %v2781_v23  ;;  %4197 = vst [vmem:[#allocation10_spill] sm:$0xff] %v2877_v5 }
  0xcf   : > { %v348_v17 = vmul.f32 %v332_v22, %v2502_v41 }
  0xd0   : > { %1778 = vadd.xlane.f32.xlu1 %v4116_v40 }
  0xd1   : > { %v358_v3 = vpack.c.bf16 %v349_v21, %v348_v17 }
  0xd2   : > { %v2108_v20 = vpop.eup %2107 }
  0xd3   : > { %750 = vmatmul.mubr.bf16.gmra.mrb[12].mxu1 %v355_v19  ;;  %637 = vmatmul.mubr.bf16.gmra.mrb[12].mxu0 %v355_v19  ;;  %v357_v19 = vpack.c.bf16 %v347_v26, %v346_v27  ;;  %v335_v32 = vmul.f32 20.0, %v2108_v20  ;;  %v392_v27 = vld [vmem:[%s4058_s3] sm:$0xf] }
  0xd4   : > { %759 = vmatprep.mubr.bf16.mxu1 %v2345_v0  ;;  %646 = vmatprep.mubr.bf16.mxu0 %v2345_v0 }
  0xd5   : > { %v351_v59 = vmul.f32 %v335_v32, %v2521_v48 }
  0xd7   : > { %v2110_v10 = vpop.eup %2109 }
  0xd8   : > { %v334_v33 = vmul.f32 20.0, %v2110_v10 }
  0xda   : > { %v350_v18 = vmul.f32 %v334_v33, %v2524_v49  ;;  %v394_v49 = vlaneseq }
  0xdb   : > { %760 = vmatmul.mubr.bf16.gmra.mrb[16].mxu1 %v356_v14  ;;  %647 = vmatmul.mubr.bf16.gmra.mrb[16].mxu0 %v356_v14  ;;  %v2879_v14 = vpop.xlane.xlu0 %1143 }
  0xdc   : > { %769 = vmatprep.mubr.bf16.mxu1 %v2345_v0  ;;  %656 = vmatprep.mubr.bf16.mxu0 %v2345_v0  ;;  %v359_v41 = vpack.c.bf16 %v351_v59, %v350_v18  ;;  %4198 = vst [vmem:[#allocation11_spill] sm:$0xff] %v2879_v14  ;;  %v395_v39 = vshrl.u32 %v394_v49, 7 }
  0xde   : > { %v404_v13 = vsub.s32 2, %v395_v39  ;;  %v396_v26 = vsub.s32 0, %v395_v39  ;;  %v400_v43 = vsub.s32 1, %v395_v39  ;;  %v408_v22 = vsub.s32 3, %v395_v39 }
  0xdf   : > { %v2881_v25 = vpop.xlane.xlu0 %1149 }
  0xe0   : > { %4199 = vst [vmem:[#allocation12_spill] sm:$0xff] %v2881_v25  ;;  %v2890_v44 = vrot.slane %v392_v27, %v404_v13  ;;  %v2894_v21 = vrot.slane %v392_v27, %v396_v26  ;;  %v2899_v32 = vrot.slane %v392_v27, %v400_v43 }
  0xe3   : > { %770 = vmatmul.mubr.bf16.gmra.mrb[20].mxu1 %v357_v19  ;;  %657 = vmatmul.mubr.bf16.gmra.mrb[20].mxu0 %v357_v19  ;;  %v2883_v48 = vpop.xlane.xlu0 %1155 }
  0xe4   : > { %779 = vmatprep.mubr.bf16.mxu1 %v2345_v0  ;;  %666 = vmatprep.mubr.bf16.mxu0 %v2345_v0  ;;  %4200 = vst [vmem:[#allocation13_spill] sm:$0xff] %v2883_v48 }
  0xeb   : > { %780 = vmatmul.mubr.bf16.gmra.mrb[24].mxu1 %v358_v3  ;;  %667 = vmatmul.mubr.bf16.gmra.mrb[24].mxu0 %v358_v3  ;;  %v2901_v3 = vrot.slane %v392_v27, %v408_v22 }
  0xec   : > { %789 = vmatprep.mubr.bf16.mxu1 %v2345_v0  ;;  %676 = vmatprep.mubr.bf16.mxu0 %v2345_v0  ;;  %v2885_v0 = vpop.xlane.xlu0 %1161 }
  0xed   : > { %4201 = vst [vmem:[#allocation14_spill] sm:$0xff] %v2885_v0  ;;  %v4215_v0 = vunpack.c.l.bf16 %v2575_v1 }
  0xf0   : > { %v2892_v19 = vpop.xlane.xlu0 %1167 }
  0xf1   : > { %4202 = vst [vmem:[#allocation15_spill] sm:$0xff] %v2892_v19 }
  0xf3   : > { %790 = vmatmul.mubr.bf16.gmra.mrb[28].mxu1 %v359_v41  ;;  %677 = vmatmul.mubr.bf16.gmra.mrb[28].mxu0 %v359_v41 }
  0xf4   : > { %v2921_v22 = vpop.xlane.xlu0 %1173 }
  0xf5   : > { %4208 = vst [vmem:[#allocation21_spill] sm:$0xff] %v2921_v22 }
  0xf8   : > { %v2944_v22 = vpop.xlane.xlu0 %1179 }
  0xf9   : > { %4213 = vst [vmem:[#allocation25_spill] sm:$0xff] %v2944_v22 }
  0xfc   : > { %v2980_v58 = vpop.xlane.xlu0 %1472 }
  0xfd   : > { %4220 = vst [vmem:[#allocation26_spill] sm:$0xff] %v2980_v58 }
 0x18e   : > { %v608_v20 = vpop.f32.mrb[0].mxu0  ;;  %v721_v17 = vpop.f32.mrb[0].mxu1 }
 0x18f   : > { %v2897_v10 = vadd.f32 %v721_v17, %v2890_v44  ;;  %v610_v33 = vpop.f32.mrb[1].mxu0  ;;  %v723_v18 = vpop.f32.mrb[1].mxu1  ;;  %v2908_v26 = vadd.f32 %v608_v20, %v2894_v21 }
 0x190   : > { %v612_v59 = vpop.f32.mrb[2].mxu0  ;;  %v725_v41 = vpop.f32.mrb[2].mxu1  ;;  %v2911_v17 = vadd.f32 %v610_v33, %v2899_v32  ;;  %v2914_v43 = vadd.f32 %v723_v18, %v2901_v3 }
 0x191   : > { %4203 = vst [vmem:[#allocation16_spill] sm:$0xff] %v2897_v10  ;;  %v2904_v49 = vadd.f32 %v725_v41, %v2890_v44  ;;  %v727_v39 = vpop.f32.mrb[3].mxu1  ;;  %1312 = vmax.xlane.f32.xlu0 %v2897_v10  ;;  %v614_v13 = vpop.f32.mrb[3].mxu0  ;;  %4205 = vst [vmem:[#allocation18_spill] sm:$0xff] %v2908_v26  ;;  %v1520_v27 = vmul.f32 %v834_v47, %v2897_v10  ;;  %v2928_v11 = vadd.f32 %v612_v59, %v2894_v21 }
 0x192   : > { %4206 = vst [vmem:[#allocation19_spill] sm:$0xff] %v2911_v17  ;;  %4207 = vst [vmem:[#allocation20_spill] sm:$0xff] %v2914_v43  ;;  %v896_v20 = vmax.f32 %v2908_v26, %v2911_v17  ;;  %v2931_v28 = vadd.f32 %v727_v39, %v2901_v3  ;;  %v2934_v47 = vadd.f32 %v614_v13, %v2899_v32 }
 0x193   : > { %4204 = vst [vmem:[#allocation17_spill] sm:$0xff] %v2904_v49  ;;  %1314 = vmax.xlane.f32.xlu1 %v2904_v49  ;;  %4209 = vst [vmem:[#allocation22_spill] sm:$0xff] %v2928_v11  ;;  %v1808_v6 = vmul.f32 %v4212_v57, %v2914_v43  ;;  %v1200_v12 = vmul.f32 %v4215_v0, %v2908_v26  ;;  %v4218_v0 = vunpack.c.l.bf16 %v2625_v36  ;;  %v4231_v26 = vunpack.c.h.bf16 %v2578_v2 }
 0x194   : > { %4210 = vst [vmem:[#allocation23_spill] sm:$0xff] %v2931_v28  ;;  %4211 = vst [vmem:[#allocation24_spill] sm:$0xff] %v2934_v47  ;;  %v899_v59 = vmax.f32 %v2928_v11, %v2934_v47 }
 0x195   : > { %1600 = vmax.xlane.f32.xlu0 %v2914_v43  ;;  %v1202_v14 = vmul.f32 %v4218_v0, %v2928_v11 }
 0x196   : > { %v618_v41 = vpop.f32.mrb[4].mxu0  ;;  %v731_v55 = vpop.f32.mrb[4].mxu1 }
 0x197   : > { %1536 = vadd.xlane.f32.xlu1 %v1520_v27  ;;  %v620_v33 = vpop.f32.mrb[5].mxu0  ;;  %v733_v9 = vpop.f32.mrb[5].mxu1  ;;  %v2987_v0 = vadd.f32 %v731_v55, %v2890_v44  ;;  %v3020_v58 = vadd.f32 %v618_v41, %v2894_v21  ;;  %v4229_v41 = vunpack.c.h.bf16 %v2695_v53 }
 0x198   : > { %v2925_v18 = vpop.f32.mrb[6].mxu0  ;;  %v735_v38 = vpop.f32.mrb[6].mxu1  ;;  %v3006_v55 = vadd.f32 %v733_v9, %v2901_v3  ;;  %v3023_v11 = vadd.f32 %v620_v33, %v2899_v32  ;;  %v4228_v9 = vunpack.c.l.bf16 %v2695_v53 }
 0x199   : > { %897 = vmax.xlane.f32.xlu0 %v896_v20  ;;  %v2936_v40 = vpop.f32.mrb[7].mxu0  ;;  %v737_v27 = vpop.f32.mrb[7].mxu1  ;;  %v4214_v20 = vunpack.c.l.bf16 %v2747_v31  ;;  %4221 = vst [vmem:[#allocation27_spill] sm:$0xff] %v2987_v0  ;;  %4226 = vst [vmem:[#allocation32_spill] sm:$0xff] %v3020_v58  ;;  %v3054_v53 = vadd.f32 %v2925_v18, %v2894_v21 }
 0x19a   : > { %4223 = vst [vmem:[#allocation29_spill] sm:$0xff] %v3006_v55  ;;  %4227 = vst [vmem:[#allocation33_spill] sm:$0xff] %v3023_v11  ;;  %v1810_v33 = vmul.f32 %v4229_v41, %v3006_v55  ;;  %v3058_v41 = vadd.f32 %v2936_v40, %v2899_v32 }
 0x19b   : > { %1602 = vmax.xlane.f32.xlu1 %v2931_v28  ;;  %v1521_v19 = vmul.f32 %v4214_v20, %v2904_v49  ;;  %4232 = vst [vmem:[#allocation34_spill] sm:$0xff] %v3054_v53 }
 0x19c   : > { %4233 = vst [vmem:[#allocation35_spill] sm:$0xff] %v3058_v41 }
 0x19d   : > { %1824 = vadd.xlane.f32.xlu0 %v1808_v6  ;;  %v4216_v6 = vunpack.c.h.bf16 %v2575_v1  ;;  %v4219_v1 = vunpack.c.h.bf16 %v2625_v36 }
 0x19e   : > { %v2946_v39 = vpop.f32.mrb[8].mxu1  ;;  %v2948_v13 = vpop.f32.mrb[8].mxu0 }
 0x19f   : > { %900 = vmax.xlane.f32.xlu1 %v899_v59  ;;  %v1201_v57 = vmul.f32 %v4216_v6, %v2911_v17  ;;  %v2959_v48 = vpop.f32.mrb[9].mxu1  ;;  %v2961_v22 = vpop.f32.mrb[9].mxu0  ;;  %v4217_v59 = vunpack.c.h.bf16 %v2747_v31  ;;  %v1203_v6 = vmul.f32 %v4219_v1, %v2934_v47 }
 0x1a0   : > { %v2963_v25 = vpop.f32.mrb[10].mxu1  ;;  %v2965_v62 = vpop.f32.mrb[10].mxu0 }
 0x1a1   : > { %1538 = vadd.xlane.f32.xlu0 %v1521_v19  ;;  %v1809_v20 = vmul.f32 %v4217_v59, %v2931_v28  ;;  %v2976_v5 = vpop.f32.mrb[11].mxu0  ;;  %v2978_v50 = vpop.f32.mrb[11].mxu1  ;;  %v1232_v49 = vadd.f32 %v1201_v57, %v1200_v12  ;;  %v1235_v19 = vadd.f32 %v1203_v6, %v1202_v14  ;;  %v2998_v14 = vadd.f32 %v735_v38, %v2890_v44 }
 0x1a2   : > { %v3010_v57 = vadd.f32 %v737_v27, %v2901_v3  ;;  %v3013_v6 = vpop.xlane.xlu0 %1476  ;;  %v1522_v27 = vmul.f32 %v4228_v9, %v2987_v0  ;;  %v902_v9 = vmax.f32 %v3020_v58, %v3023_v11 }
 0x1a3   : > { %1826 = vadd.xlane.f32.xlu1 %v1809_v20  ;;  %4222 = vst [vmem:[#allocation28_spill] sm:$0xff] %v2998_v14  ;;  %4225 = vst [vmem:[#allocation31_spill] sm:$0xff] %v3013_v6 }
 0x1a4   : > { %4224 = vst [vmem:[#allocation30_spill] sm:$0xff] %v3010_v57 }
 0x1a5   : > { %1233 = vadd.xlane.f32.xlu0 %v1232_v49 }
 0x1a6   : > { %v2982_v31 = vpop.f32.mrb[12].mxu1  ;;  %v2984_v59 = vpop.f32.mrb[12].mxu0 }
 0x1a7   : > { %1236 = vadd.xlane.f32.xlu1 %v1235_v19  ;;  %v2989_v36 = vpop.f32.mrb[13].mxu1  ;;  %v2991_v1 = vpop.f32.mrb[13].mxu0 }
 0x1a8   : > { %v2993_v47 = vpop.f32.mrb[14].mxu1  ;;  %v2995_v20 = vpop.f32.mrb[14].mxu0 }
 0x1a9   : > { %1316 = vmax.xlane.f32.xlu0 %v2987_v0  ;;  %v3001_v49 = vpop.f32.mrb[15].mxu1  ;;  %v3003_v12 = vpop.f32.mrb[15].mxu0  ;;  %v4230_v0 = vunpack.c.l.bf16 %v2578_v2 }
 0x1aa   : > { %v3063_v43 = vpop.xlane.xlu0 %1480 }
 0x1ab   : > { %1318 = vmax.xlane.f32.xlu1 %v2998_v14  ;;  %v1204_v17 = vmul.f32 %v4230_v0, %v3020_v58  ;;  %4235 = vst [vmem:[#allocation36_spill] sm:$0xff] %v3063_v43  ;;  %v3065_v0 = vpop.xlane.xlu1 %1140  ;;  %v905_v43 = vmax.f32 %v3054_v53, %v3058_v41 }
 0x1ac   : > { %4236 = vst [vmem:[#allocation37_spill] sm:$0xff] %v3065_v0 }
 0x1ad   : > { %1604 = vmax.xlane.f32.xlu0 %v3006_v55 }
 0x1ae   : > { %v3015_v38 = vpop.f32.mrb[16].mxu1  ;;  %v3017_v19 = vpop.f32.mrb[16].mxu0 }
 0x1af   : > { %1606 = vmax.xlane.f32.xlu1 %v3010_v57  ;;  %v3029_v28 = vpop.f32.mrb[17].mxu1  ;;  %v3031_v4 = vpop.f32.mrb[17].mxu0 }
 0x1b0   : > { %v3033_v6 = vpop.f32.mrb[18].mxu1  ;;  %v3035_v15 = vpop.f32.mrb[18].mxu0 }
 0x1b1   : > { %1540 = vadd.xlane.f32.xlu0 %v1522_v27  ;;  %v3040_v46 = vpop.f32.mrb[19].mxu1  ;;  %v3042_v8 = vpop.f32.mrb[19].mxu0  ;;  %v1205_v27 = vmul.f32 %v4231_v26, %v3023_v11 }
 0x1b3   : > { %1828 = vadd.xlane.f32.xlu1 %v1810_v33  ;;  %v4234_v33 = vunpack.c.l.bf16 %v2757_v60  ;;  %v1238_v26 = vadd.f32 %v1205_v27, %v1204_v17  ;;  %v4241_v17 = vunpack.c.h.bf16 %v2757_v60  ;;  %v4245_v60 = vunpack.c.h.bf16 %v2633_v42 }
 0x1b5   : > { %903 = vmax.xlane.f32.xlu0 %v902_v9  ;;  %v1523_v55 = vmul.f32 %v4234_v33, %v2998_v14  ;;  %v3081_v33 = vadd.f32 %v2946_v39, %v2890_v44  ;;  %v1811_v27 = vmul.f32 %v4241_v17, %v3010_v57  ;;  %v4242_v14 = vunpack.c.l.bf16 %v2633_v42  ;;  %v3111_v57 = vpop.xlane.xlu0 %1484 }
 0x1b6   : > { %v3067_v58 = vpop.f32.mrb[20].mxu1  ;;  %v3069_v2 = vpop.f32.mrb[20].mxu0  ;;  %v3098_v39 = vadd.f32 %v2959_v48, %v2901_v3  ;;  %v1207_v17 = vmul.f32 %v4245_v60, %v3058_v41  ;;  %4246 = vst [vmem:[#allocation44_spill] sm:$0xff] %v3111_v57  ;;  %v4250_v42 = vunpack.c.l.bf16 %v2585_v7  ;;  %v4251_v57 = vunpack.c.h.bf16 %v2585_v7 }
 0x1b7   : > { %1542 = vadd.xlane.f32.xlu1 %v1523_v55  ;;  %v3071_v18 = vpop.f32.mrb[21].mxu1  ;;  %v3073_v11 = vpop.f32.mrb[21].mxu0  ;;  %4238 = vst [vmem:[#allocation39_spill] sm:$0xff] %v3081_v33 }
 0x1b8   : > { %v3075_v40 = vpop.f32.mrb[22].mxu1  ;;  %v3077_v9 = vpop.f32.mrb[22].mxu0 }
 0x1b9   : > { %4237 = vst [vmem:[#allocation38_spill] sm:$0xff] %v3077_v9  ;;  %1239 = vadd.xlane.f32.xlu0 %v1238_v26  ;;  %v3085_v0 = vpop.f32.mrb[23].mxu1  ;;  %v3087_v55 = vpop.f32.mrb[23].mxu0  ;;  %v1206_v26 = vmul.f32 %v4242_v14, %v3054_v53  ;;  %v3102_v9 = vadd.f32 %v2948_v13, %v2894_v21 }
 0x1ba   : > { %4239 = vst [vmem:[#allocation40_spill] sm:$0xff] %v3085_v0  ;;  %4240 = vst [vmem:[#allocation41_spill] sm:$0xff] %v3087_v55  ;;  %v3113_v14 = vpop.xlane.xlu1 %1146 }
 0x1bb   : > { %906 = vmax.xlane.f32.xlu1 %v905_v43  ;;  %4243 = vst [vmem:[#allocation42_spill] sm:$0xff] %v3102_v9  ;;  %v3106_v43 = vadd.f32 %v2961_v22, %v2899_v32  ;;  %4247 = vst [vmem:[#allocation45_spill] sm:$0xff] %v3113_v14  ;;  %v1208_v60 = vmul.f32 %v4250_v42, %v3102_v9  ;;  %v1241_v41 = vadd.f32 %v1207_v17, %v1206_v26 }
 0x1bc   : > { %v3144_v42 = vadd.f32 %v2963_v25, %v2890_v44  ;;  %v4254_v25 = vunpack.c.l.bf16 %v2710_v51 }
 0x1bd   : > { %1320 = vmax.xlane.f32.xlu0 %v3081_v33  ;;  %4244 = vst [vmem:[#allocation43_spill] sm:$0xff] %v3106_v43  ;;  %v1209_v14 = vmul.f32 %v4251_v57, %v3106_v43 }
 0x1be   : > { %v3115_v53 = vpop.f32.mrb[24].mxu1  ;;  %v3117_v48 = vpop.f32.mrb[24].mxu0 }
 0x1bf   : > { %1830 = vadd.xlane.f32.xlu1 %v1811_v27  ;;  %v3119_v55 = vpop.f32.mrb[25].mxu1  ;;  %v3121_v13 = vpop.f32.mrb[25].mxu0  ;;  %v908_v27 = vmax.f32 %v3102_v9, %v3106_v43  ;;  %v1244_v7 = vadd.f32 %v1209_v14, %v1208_v60  ;;  %v1524_v14 = vmul.f32 %v4254_v25, %v3081_v33  ;;  %v3183_v25 = vadd.f32 %v2991_v1, %v2899_v32 }
 0x1c0   : > { %v3123_v0 = vpop.f32.mrb[26].mxu1  ;;  %v3125_v22 = vpop.f32.mrb[26].mxu0  ;;  %v4264_v1 = vunpack.c.h.bf16 %v2710_v51  ;;  %v4266_v51 = vunpack.c.l.bf16 %v2766_v35 }
 0x1c1   : > { %4248 = vst [vmem:[#allocation46_spill] sm:$0xff] %v3123_v0  ;;  %4249 = vst [vmem:[#allocation47_spill] sm:$0xff] %v3125_v22  ;;  %1608 = vmax.xlane.f32.xlu0 %v3098_v39  ;;  %v3136_v29 = vpop.f32.mrb[27].mxu1  ;;  %v3138_v10 = vpop.f32.mrb[27].mxu0 }
 0x1c2   : > { %v3140_v22 = vpop.xlane.xlu0 %1488  ;;  %v3146_v57 = vpop.xlane.xlu1 %1152  ;;  %4258 = vst [vmem:[#allocation53_spill] sm:$0xff] %v3183_v25  ;;  %v1812_v9 = vmul.f32 %v4264_v1, %v3098_v39 }
 0x1c3   : > { %1242 = vadd.xlane.f32.xlu1 %v1241_v41  ;;  %4252 = vst [vmem:[#allocation48_spill] sm:$0xff] %v3140_v22  ;;  %4253 = vst [vmem:[#allocation49_spill] sm:$0xff] %v3146_v57  ;;  %v3159_v41 = vadd.f32 %v2982_v31, %v2890_v44  ;;  %v3170_v22 = vadd.f32 %v2978_v50, %v2901_v3  ;;  %v3179_v31 = vadd.f32 %v2984_v59, %v2894_v21 }
 0x1c4   : > { %v4263_v59 = vunpack.c.h.bf16 %v2598_v16 }
 0x1c5   : > { %909 = vmax.xlane.f32.xlu0 %v908_v27  ;;  %4257 = vst [vmem:[#allocation52_spill] sm:$0xff] %v3179_v31 }
 0x1c6   : > { %v3148_v0 = vpop.f32.mrb[28].mxu1  ;;  %v3150_v26 = vpop.f32.mrb[28].mxu0  ;;  %v1213_v57 = vmul.f32 %v4263_v59, %v3183_v25  ;;  %v1525_v59 = vmul.f32 %v4266_v51, %v3144_v42 }
 0x1c7   : > { %1322 = vmax.xlane.f32.xlu1 %v3144_v42  ;;  %v3153_v17 = vpop.f32.mrb[29].mxu1  ;;  %v3155_v43 = vpop.f32.mrb[29].mxu0 }
 0x1c8   : > { %v3164_v60 = vpop.xlane.xlu0 %1492  ;;  %v3166_v27 = vpop.xlane.xlu1 %1158 }
 0x1c9   : > { %1245 = vadd.xlane.f32.xlu0 %v1244_v7  ;;  %4255 = vst [vmem:[#allocation50_spill] sm:$0xff] %v3164_v60  ;;  %4256 = vst [vmem:[#allocation51_spill] sm:$0xff] %v3166_v27  ;;  %v3175_v7 = vadd.f32 %v2989_v36, %v2901_v3  ;;  %v3188_v50 = vpop.f32.mrb[30].mxu0  ;;  %v3190_v60 = vpop.f32.mrb[30].mxu1  ;;  %v4262_v36 = vunpack.c.l.bf16 %v2598_v16  ;;  %v3212_v16 = vadd.f32 %v2965_v62, %v2894_v21 }
 0x1ca   : > { %4260 = vst [vmem:[#allocation55_spill] sm:$0xff] %v3188_v50  ;;  %4261 = vst [vmem:[#allocation56_spill] sm:$0xff] %v3190_v60  ;;  %v3204_v50 = vpop.f32.mrb[31].mxu0  ;;  %v3206_v60 = vpop.f32.mrb[31].mxu1  ;;  %v3227_v62 = vadd.f32 %v3015_v38, %v2890_v44  ;;  %v3242_v38 = vadd.f32 %v3029_v28, %v2901_v3 }
 0x1cb   : > { %1544 = vadd.xlane.f32.xlu1 %v1524_v14  ;;  %v1212_v27 = vmul.f32 %v4262_v36, %v3179_v31  ;;  %v3216_v36 = vadd.f32 %v2976_v5, %v2899_v32 }
 0x1cc   : > { %v3186_v14 = vpop.xlane.xlu0 %1762  ;;  %v3208_v33 = vpop.xlane.xlu1 %1164 }
 0x1cd   : > { %1324 = vmax.xlane.f32.xlu0 %v3159_v41  ;;  %4259 = vst [vmem:[#allocation54_spill] sm:$0xff] %v3186_v14  ;;  %v914_v14 = vmax.f32 %v3179_v31, %v3183_v25  ;;  %4265 = vst [vmem:[#allocation57_spill] sm:$0xff] %v3208_v33  ;;  %v1250_v1 = vadd.f32 %v1213_v57, %v1212_v27  ;;  %v911_v5 = vmax.f32 %v3212_v16, %v3216_v36 }
 0x1ce   : > { %v4270_v57 = vunpack.c.l.bf16 %v2638_v45 }
 0x1cf   : > { %1610 = vmax.xlane.f32.xlu1 %v3170_v22 }
 0x1d0   : > { %v3221_v25 = vpop.xlane.xlu0 %1766  ;;  %v3223_v31 = vpop.xlane.xlu1 %1170  ;;  %v1210_v27 = vmul.f32 %v4270_v57, %v3212_v16 }
 0x1d1   : > { %1612 = vmax.xlane.f32.xlu0 %v3175_v7  ;;  %4267 = vst [vmem:[#allocation58_spill] sm:$0xff] %v3221_v25  ;;  %4268 = vst [vmem:[#allocation59_spill] sm:$0xff] %v3223_v31  ;;  %v4329_v25 = vld [vmem:[#allocation41_spill] sm:$0xff] }
 0x1d3   : > { %1832 = vadd.xlane.f32.xlu1 %v1812_v9  ;;  %v4269_v9 = vunpack.c.h.bf16 %v2766_v35  ;;  %v3250_v35 = vadd.f32 %v3031_v4, %v2899_v32  ;;  %v3266_v4 = vadd.f32 %v2993_v47, %v2890_v44  ;;  %v4279_v47 = vunpack.c.h.bf16 %v2607_v24 }
 0x1d4   : > { %v3237_v51 = vpop.xlane.xlu0 %1768 }
 0x1d5   : > { %915 = vmax.xlane.f32.xlu0 %v914_v14  ;;  %v1813_v14 = vmul.f32 %v4269_v9, %v3170_v22  ;;  %4271 = vst [vmem:[#allocation60_spill] sm:$0xff] %v3237_v51  ;;  %v3255_v9 = vpop.xlane.xlu1 %1176 }
 0x1d6   : > { %4273 = vst [vmem:[#allocation61_spill] sm:$0xff] %v3255_v9 }
 0x1d7   : > { %1546 = vadd.xlane.f32.xlu1 %v1525_v59  ;;  %v3246_v59 = vadd.f32 %v3017_v19, %v2894_v21 }
 0x1d8   : > { %v3260_v31 = vpop.xlane.xlu0 %1770 }
 0x1d9   : > { %1251 = vadd.xlane.f32.xlu0 %v1250_v1  ;;  %v4272_v1 = vunpack.c.h.bf16 %v2638_v45  ;;  %v920_v28 = vmax.f32 %v3246_v59, %v3250_v35  ;;  %4274 = vst [vmem:[#allocation62_spill] sm:$0xff] %v3260_v31  ;;  %v3262_v19 = vpop.xlane.xlu1 %1182  ;;  %v3270_v45 = vadd.f32 %v3033_v6, %v2890_v44  ;;  %v4280_v6 = vunpack.c.l.bf16 %v2725_v61 }
 0x1da   : > { %4275 = vst [vmem:[#allocation63_spill] sm:$0xff] %v3262_v19  ;;  %v3294_v31 = vadd.f32 %v3001_v49, %v2901_v3  ;;  %v3310_v49 = vadd.f32 %v2995_v20, %v2894_v21  ;;  %v3328_v20 = vadd.f32 %v3069_v2, %v2894_v21 }
 0x1db   : > { %912 = vmax.xlane.f32.xlu1 %v911_v5  ;;  %v1211_v5 = vmul.f32 %v4272_v1, %v3216_v36  ;;  %v1526_v19 = vmul.f32 %v4280_v6, %v3159_v41 }
 0x1dc   : > { %v3276_v1 = vpop.xlane.xlu0 %1772 }
 0x1dd   : > { %1328 = vmax.xlane.f32.xlu0 %v3227_v62  ;;  %v1247_v57 = vadd.f32 %v1211_v5, %v1210_v27  ;;  %4277 = vst [vmem:[#allocation64_spill] sm:$0xff] %v3276_v1  ;;  %v4278_v5 = vunpack.c.l.bf16 %v2607_v24  ;;  %v3290_v33 = vpop.xlane.xlu1 %1474 }
 0x1de   : > { %4282 = vst [vmem:[#allocation65_spill] sm:$0xff] %v3290_v33 }
 0x1df   : > { %1834 = vadd.xlane.f32.xlu1 %v1813_v14  ;;  %v4276_v14 = vunpack.c.h.bf16 %v2737_v34 }
 0x1e0   : > { %v3296_v24 = vpop.xlane.xlu0 %1774 }
 0x1e1   : > { %1616 = vmax.xlane.f32.xlu0 %v3242_v38  ;;  %v1816_v27 = vmul.f32 %v4276_v14, %v3242_v38  ;;  %v4281_v14 = vunpack.c.l.bf16 %v2781_v23  ;;  %4283 = vst [vmem:[#allocation66_spill] sm:$0xff] %v3296_v24  ;;  %v4295_v24 = vunpack.c.h.bf16 %v2775_v54 }
 0x1e3   : > { %1248 = vadd.xlane.f32.xlu1 %v1247_v57  ;;  %v1216_v57 = vmul.f32 %v4278_v5, %v3246_v59  ;;  %v1529_v9 = vmul.f32 %v4281_v14, %v3270_v45 }
 0x1e5   : > { %921 = vmax.xlane.f32.xlu0 %v920_v28  ;;  %v1217_v28 = vmul.f32 %v4279_v47, %v3250_v35  ;;  %v3303_v47 = vadd.f32 %v3067_v58, %v2890_v44  ;;  %v3321_v58 = vadd.f32 %v3071_v18, %v2901_v3 }
 0x1e7   : > { %1326 = vmax.xlane.f32.xlu1 %v3266_v4  ;;  %v1256_v5 = vadd.f32 %v1217_v28, %v1216_v57  ;;  %v3316_v57 = vpop.xlane.xlu0 %1776 }
 0x1e8   : > { %4286 = vst [vmem:[#allocation68_spill] sm:$0xff] %v3316_v57 }
 0x1e9   : > { %1840 = vadd.xlane.f32.xlu0 %v1816_v27  ;;  %v3299_v27 = vpop.xlane.xlu1 %1478 }
 0x1ea   : > { %4284 = vst [vmem:[#allocation67_spill] sm:$0xff] %v3299_v27 }
 0x1eb   : > { %1548 = vadd.xlane.f32.xlu1 %v1526_v19  ;;  %v4285_v19 = vunpack.c.h.bf16 %v2725_v61  ;;  %v4287_v61 = vunpack.c.l.bf16 %v2775_v54  ;;  %v3375_v54 = vadd.f32 %v3117_v48, %v2894_v21  ;;  %v4302_v48 = vunpack.c.l.bf16 %v2737_v34 }
 0x1ed   : > { %1554 = vadd.xlane.f32.xlu0 %v1529_v9  ;;  %v1814_v6 = vmul.f32 %v4285_v19, %v3175_v7  ;;  %v3314_v9 = vadd.f32 %v3003_v12, %v2899_v32  ;;  %v1527_v28 = vmul.f32 %v4287_v61, %v3266_v4  ;;  %v3332_v12 = vadd.f32 %v3073_v11, %v2899_v32  ;;  %v3334_v14 = vpop.xlane.xlu1 %1482  ;;  %v3347_v61 = vpop.xlane.xlu0 %1780 }
 0x1ee   : > { %4288 = vst [vmem:[#allocation69_spill] sm:$0xff] %v3334_v14  ;;  %v4290_v19 = vunpack.c.h.bf16 %v2616_v30  ;;  %4291 = vst [vmem:[#allocation70_spill] sm:$0xff] %v3347_v61  ;;  %v1815_v14 = vmul.f32 %v4295_v24, %v3294_v31 }
 0x1ef   : > { %1614 = vmax.xlane.f32.xlu1 %v3294_v31  ;;  %v917_v2 = vmax.f32 %v3310_v49, %v3314_v9  ;;  %v926_v11 = vmax.f32 %v3328_v20, %v3332_v12 }
 0x1f1   : > { %1257 = vadd.xlane.f32.xlu0 %v1256_v5  ;;  %v4289_v5 = vunpack.c.l.bf16 %v2616_v30  ;;  %v4294_v30 = vunpack.c.h.bf16 %v2660_v56  ;;  %v3360_v51 = vpop.xlane.xlu0 %1496 }
 0x1f2   : > { %4296 = vst [vmem:[#allocation72_spill] sm:$0xff] %v3360_v51 }
 0x1f3   : > { %1836 = vadd.xlane.f32.xlu1 %v1814_v6  ;;  %v1220_v18 = vmul.f32 %v4289_v5, %v3328_v20  ;;  %v1221_v6 = vmul.f32 %v4290_v19, %v3332_v12  ;;  %v4293_v5 = vunpack.c.l.bf16 %v2660_v56  ;;  %v1215_v19 = vmul.f32 %v4294_v30, %v3314_v9 }
 0x1f4   : > { %v3371_v56 = vadd.f32 %v3119_v55, %v2901_v3  ;;  %v4301_v55 = vunpack.c.h.bf16 %v2628_v37  ;;  %v3410_v30 = vadd.f32 %v3042_v8, %v2899_v32  ;;  %v4307_v8 = vunpack.c.l.bf16 %v2675_v63 }
 0x1f5   : > { %1332 = vmax.xlane.f32.xlu0 %v3303_v47  ;;  %v1214_v57 = vmul.f32 %v4293_v5, %v3310_v49  ;;  %v1262_v1 = vadd.f32 %v1221_v6, %v1220_v18 }
 0x1f7   : > { %1550 = vadd.xlane.f32.xlu1 %v1527_v28  ;;  %v3349_v28 = vpop.xlane.xlu1 %1486  ;;  %v1253_v61 = vadd.f32 %v1215_v19, %v1214_v57  ;;  %v4300_v57 = vunpack.c.l.bf16 %v2628_v37  ;;  %v3406_v37 = vadd.f32 %v3035_v15, %v2894_v21 }
 0x1f8   : > { %4292 = vst [vmem:[#allocation71_spill] sm:$0xff] %v3349_v28 }
 0x1f9   : > { %1620 = vmax.xlane.f32.xlu0 %v3321_v58 }
 0x1fb   : > { %918 = vmax.xlane.f32.xlu1 %v917_v2  ;;  %v3364_v2 = vadd.f32 %v3115_v53, %v2890_v44  ;;  %v3366_v5 = vpop.xlane.xlu1 %1490  ;;  %v3381_v53 = vpop.xlane.xlu0 %1782 }
 0x1fc   : > { %4297 = vst [vmem:[#allocation73_spill] sm:$0xff] %v3366_v5  ;;  %4298 = vst [vmem:[#allocation74_spill] sm:$0xff] %v3381_v53 }
 0x1fd   : > { %927 = vmax.xlane.f32.xlu0 %v926_v11 }
 0x1ff   : > { %1838 = vadd.xlane.f32.xlu1 %v1815_v14  ;;  %v3384_v24 = vpop.xlane.xlu1 %1494  ;;  %v1224_v14 = vmul.f32 %v4300_v57, %v3375_v54  ;;  %v3398_v11 = vpop.xlane.xlu0 %1498  ;;  %v3417_v57 = vadd.f32 %v3148_v0, %v2890_v44  ;;  %v4310_v0 = vunpack.c.h.bf16 %v2675_v63  ;;  %v4315_v63 = vunpack.c.l.bf16 %v2651_v52 }
 0x200   : > { %4299 = vst [vmem:[#allocation75_spill] sm:$0xff] %v3384_v24  ;;  %4303 = vst [vmem:[#allocation76_spill] sm:$0xff] %v3398_v11  ;;  %v4325_v24 = vld [vmem:[#allocation19_spill] sm:$0xff] }
 0x201   : > { %1263 = vadd.xlane.f32.xlu0 %v1262_v1  ;;  %v3379_v1 = vadd.f32 %v3121_v13, %v2899_v32  ;;  %v1528_v13 = vmul.f32 %v4302_v48, %v3227_v62  ;;  %4305 = vst [vmem:[#allocation78_spill] sm:$0xff] %v3417_v57 }
 0x203   : > { %1254 = vadd.xlane.f32.xlu1 %v1253_v61  ;;  %v1225_v18 = vmul.f32 %v4301_v55, %v3379_v1  ;;  %v932_v6 = vmax.f32 %v3375_v54, %v3379_v1  ;;  %v3402_v61 = vadd.f32 %v3040_v46, %v2901_v3  ;;  %v3412_v19 = vpop.xlane.xlu1 %1760  ;;  %v923_v46 = vmax.f32 %v3406_v37, %v3410_v30  ;;  %v3421_v15 = vpop.xlane.xlu0 %1784 }
 0x204   : > { %4304 = vst [vmem:[#allocation77_spill] sm:$0xff] %v3412_v19  ;;  %4306 = vst [vmem:[#allocation79_spill] sm:$0xff] %v3421_v15  ;;  %v1218_v55 = vmul.f32 %v4307_v8, %v3406_v37 }
 0x205   : > { %1336 = vmax.xlane.f32.xlu0 %v3364_v2  ;;  %v1268_v34 = vadd.f32 %v1225_v18, %v1224_v14  ;;  %v4308_v14 = vunpack.c.h.bf16 %v2781_v23  ;;  %v3445_v23 = vadd.f32 %v3155_v43, %v2899_v32  ;;  %v3462_v43 = vadd.f32 %v3075_v40, %v2890_v44  ;;  %v4321_v40 = vld [vmem:[#allocation20_spill] sm:$0xff] }
 0x207   : > { %1330 = vmax.xlane.f32.xlu1 %v3270_v45  ;;  %v1817_v18 = vmul.f32 %v4308_v14, %v3402_v61  ;;  %v3429_v48 = vpop.xlane.xlu1 %1764  ;;  %4313 = vst [vmem:[#allocation83_spill] sm:$0xff] %v3445_v23  ;;  %v4316_v14 = vunpack.c.h.bf16 %v2651_v52  ;;  %v4318_v52 = vld [vmem:[#allocation16_spill] sm:$0xff] }
 0x208   : > { %4309 = vst [vmem:[#allocation80_spill] sm:$0xff] %v3429_v48  ;;  %v4336_v48 = vld [vmem:[#allocation2_spill] sm:$0xff] }
 0x209   : > { %1624 = vmax.xlane.f32.xlu0 %v3371_v56 }
 0x20b   : > { %1552 = vadd.xlane.f32.xlu1 %v1528_v13  ;;  %v1219_v13 = vmul.f32 %v4310_v0, %v3410_v30  ;;  %v3458_v15 = vpop.xlane.xlu1 %1778 }
 0x20c   : > { %4317 = vst [vmem:[#allocation85_spill] sm:$0xff] %v3458_v15 }
 0x20d   : > { %933 = vmax.xlane.f32.xlu0 %v932_v6  ;;  %v3437_v6 = vadd.f32 %v3153_v17, %v2901_v3  ;;  %v1229_v17 = vmul.f32 %v4316_v14, %v3445_v23  ;;  %v1259_v0 = vadd.f32 %v1219_v13, %v1218_v55 }
 0x20f   : > { %1618 = vmax.xlane.f32.xlu1 %v3402_v61  ;;  %4311 = vst [vmem:[#allocation81_spill] sm:$0xff] %v3437_v6 }
 0x211   : > { %1269 = vadd.xlane.f32.xlu0 %v1268_v34  ;;  %v3441_v34 = vadd.f32 %v3150_v26, %v2894_v21 }
 0x213   : > { %924 = vmax.xlane.f32.xlu1 %v923_v46  ;;  %4312 = vst [vmem:[#allocation82_spill] sm:$0xff] %v3441_v34  ;;  %v3447_v46 = vpop.xlane.xlu0 %1500  ;;  %v1228_v8 = vmul.f32 %v4315_v63, %v3441_v34  ;;  %v938_v26 = vmax.f32 %v3441_v34, %v3445_v23 }
 0x214   : > { %4314 = vst [vmem:[#allocation84_spill] sm:$0xff] %v3447_v46  ;;  %v4319_v46 = vld [vmem:[#allocation5_spill] sm:$0xff] }
 0x215   : > { %1340 = vmax.xlane.f32.xlu0 %v3417_v57  ;;  %v4320_v11 = vunpack.c.l.bf16 %v4319_v46 }
 0x217   : > { %1842 = vadd.xlane.f32.xlu1 %v1817_v18  ;;  %v1274_v18 = vadd.f32 %v1229_v17, %v1228_v8 }
 0x219   : > { %1628 = vmax.xlane.f32.xlu0 %v3437_v6 }
 0x21b   : > { %1260 = vadd.xlane.f32.xlu1 %v1259_v0  ;;  %v1530_v0 = vmul.f32 %v4320_v11, %v3303_v47  ;;  %v4324_v11 = vld [vmem:[#allocation18_spill] sm:$0xff] }
 0x21d   : > { %939 = vmax.xlane.f32.xlu0 %v938_v26  ;;  %v4323_v26 = vld [vmem:[#allocation40_spill] sm:$0xff] }
 0x21e   : > { %v3464_v63 = vpop.xlane.xlu0 %1312 }
 0x21f   : > { %v1344_v14 = vsub.f32 %v4318_v52, %v3464_v63  ;;  %1334 = vmax.xlane.f32.xlu1 %v3462_v43  ;;  %v3482_v52 = vadd.f32 %v4323_v26, %v2901_v3  ;;  %v4326_v26 = vunpack.c.h.bf16 %v4319_v46 }
 0x220   : > { %v3469_v55 = vpop.xlane.xlu1 %1314 }
 0x221   : > { %v1360_v13 = vmul.f32 1.442695, %v1344_v14  ;;  %1275 = vadd.xlane.f32.xlu0 %v1274_v18  ;;  %v1818_v5 = vmul.f32 %v4326_v26, %v3321_v58 }
 0x222   : > { %v3474_v51 = vpop.xlane.xlu0 %1600 }
 0x223   : > { %2111 = vpow2.f32 %v1360_v13  ;;  %v1632_v8 = vsub.f32 %v4321_v40, %v3474_v51  ;;  %1556 = vadd.xlane.f32.xlu1 %v1530_v0 }
 0x224   : > { %v3478_v17 = vpop.xlane.xlu1 %1536 }
 0x225   : > { %4322 = vst [vmem:[#allocation16_spill] sm:$0xff] %v3478_v17  ;;  %v1648_v53 = vmul.f32 1.442695, %v1632_v8 }
 0x226   : > { %v3484_v14 = vpop.xlane.xlu0 %897 }
 0x227   : > { %2113 = vpow2.f32 %v1648_v53  ;;  %v944_v18 = vsub.f32 %v4324_v11, %v3484_v14  ;;  %v945_v13 = vsub.f32 %v4325_v24, %v3484_v14  ;;  %1622 = vmax.xlane.f32.xlu1 %v3482_v52  ;;  %v4328_v24 = vld [vmem:[#allocation38_spill] sm:$0xff] }
 0x228   : > { %v3491_v40 = vpop.xlane.xlu1 %1602  ;;  %v3502_v28 = vadd.f32 %v4328_v24, %v2894_v21 }
 0x229   : > { %v976_v0 = vmul.f32 1.442695, %v944_v18  ;;  %v978_v15 = vmul.f32 1.442695, %v945_v13  ;;  %v3506_v18 = vadd.f32 %v4329_v25, %v2899_v32  ;;  %v4330_v13 = vld [vmem:[#allocation6_spill] sm:$0xff] }
 0x22a   : > { %v3496_v8 = vpop.xlane.xlu0 %1824  ;;  %v4331_v46 = vunpack.c.l.bf16 %v4330_v13 }
 0x22b   : > { %4327 = vst [vmem:[#allocation5_spill] sm:$0xff] %v3496_v8  ;;  %2115 = vpow2.f32 %v976_v0  ;;  %1844 = vadd.xlane.f32.xlu1 %v1818_v5  ;;  %v929_v0 = vmax.f32 %v3502_v28, %v3506_v18 }
 0x22c   : > { %2117 = vpow2.f32 %v978_v15  ;;  %v3498_v53 = vpop.xlane.xlu1 %900  ;;  %v1531_v26 = vmul.f32 %v4331_v46, %v3462_v43  ;;  %v4337_v46 = vunpack.c.l.bf16 %v4336_v48 }
 0x22d   : > { %v2112_v11 = vpop.eup %2111 }
 0x22e   : > { %1392 = vadd.xlane.f32.xlu0 %v2112_v11  ;;  %v3511_v27 = vpop.xlane.xlu0 %1538  ;;  %v1222_v11 = vmul.f32 %v4337_v46, %v3502_v28 }
 0x22f   : > { %4332 = vst [vmem:[#allocation20_spill] sm:$0xff] %v3511_v27  ;;  %1558 = vadd.xlane.f32.xlu1 %v1531_v26  ;;  %v4338_v26 = vunpack.c.h.bf16 %v4336_v48  ;;  %v4343_v48 = vld [vmem:[#allocation29_spill] sm:$0xff] }
 0x230   : > { %v3513_v5 = vpop.xlane.xlu1 %1826 }
 0x231   : > { %4333 = vst [vmem:[#allocation40_spill] sm:$0xff] %v3513_v5  ;;  %v2114_v15 = vpop.eup %2113  ;;  %v1223_v27 = vmul.f32 %v4338_v26, %v3506_v18  ;;  %v4339_v5 = vunpack.c.h.bf16 %v4330_v13  ;;  %v4345_v26 = vld [vmem:[#allocation46_spill] sm:$0xff] }
 0x232   : > { %1680 = vadd.xlane.f32.xlu0 %v2114_v15  ;;  %v3517_v24 = vpop.xlane.xlu0 %1233  ;;  %v3544_v57 = vadd.f32 %v4345_v26, %v2890_v44 }
 0x233   : > { %4334 = vst [vmem:[#allocation18_spill] sm:$0xff] %v3517_v24  ;;  %930 = vmax.xlane.f32.xlu1 %v929_v0  ;;  %v1819_v23 = vmul.f32 %v4339_v5, %v3482_v52  ;;  %v4341_v0 = vld [vmem:[#allocation27_spill] sm:$0xff]  ;;  %v1265_v46 = vadd.f32 %v1223_v27, %v1222_v11  ;;  %v4351_v11 = vld [vmem:[#allocation32_spill] sm:$0xff] }
 0x234   : > { %v3519_v25 = vpop.xlane.xlu1 %1236 }
 0x235   : > { %4335 = vst [vmem:[#allocation19_spill] sm:$0xff] %v3519_v25  ;;  %v2116_v33 = vpop.eup %2115 }
 0x236   : > { %v2118_v34 = vpop.eup %2117  ;;  %v3530_v15 = vpop.xlane.xlu0 %1316 }
 0x237   : > { %4340 = vst [vmem:[#allocation38_spill] sm:$0xff] %v3530_v15  ;;  %v1346_v6 = vsub.f32 %v4341_v0, %v3530_v15  ;;  %1846 = vadd.xlane.f32.xlu1 %v1819_v23  ;;  %v1040_v25 = vadd.f32 %v2118_v34, %v2116_v33 }
 0x238   : > { %v3534_v8 = vpop.xlane.xlu1 %1318 }
 0x239   : > { %v1364_v24 = vmul.f32 1.442695, %v1346_v6  ;;  %1041 = vadd.xlane.f32.xlu0 %v1040_v25  ;;  %v4348_v6 = vld [vmem:[#allocation7_spill] sm:$0xff] }
 0x23a   : > { %v3536_v17 = vpop.xlane.xlu0 %1604  ;;  %v4349_v34 = vunpack.c.l.bf16 %v4348_v6 }
 0x23b   : > { %4342 = vst [vmem:[#allocation41_spill] sm:$0xff] %v3536_v17  ;;  %2119 = vpow2.f32 %v1364_v24  ;;  %v1634_v13 = vsub.f32 %v4343_v48, %v3536_v17  ;;  %1266 = vadd.xlane.f32.xlu1 %v1265_v46  ;;  %v4352_v46 = vld [vmem:[#allocation33_spill] sm:$0xff] }
 0x23c   : > { %v3540_v5 = vpop.xlane.xlu1 %1606  ;;  %v1532_v24 = vmul.f32 %v4349_v34, %v3364_v2 }
 0x23d   : > { %4344 = vst [vmem:[#allocation6_spill] sm:$0xff] %v3540_v5  ;;  %v1652_v23 = vmul.f32 1.442695, %v1634_v13 }
 0x23e   : > { %v3546_v33 = vpop.xlane.xlu0 %1540 }
 0x23f   : > { %4346 = vst [vmem:[#allocation2_spill] sm:$0xff] %v3546_v33  ;;  %2121 = vpow2.f32 %v1652_v23  ;;  %1338 = vmax.xlane.f32.xlu1 %v3544_v57  ;;  %v3564_v23 = vadd.f32 %v3136_v29, %v2901_v3  ;;  %v3577_v29 = vadd.f32 %v3138_v10, %v2899_v32 }
 0x240   : > { %v3549_v27 = vpop.xlane.xlu1 %1828 }
 0x241   : > { %4347 = vst [vmem:[#allocation27_spill] sm:$0xff] %v3549_v27  ;;  %4354 = vst [vmem:[#allocation32_spill] sm:$0xff] %v3564_v23 }
 0x242   : > { %v3554_v25 = vpop.xlane.xlu0 %903  ;;  %4358 = vst [vmem:[#allocation86_spill] sm:$0xff] %v3577_v29 }
 0x243   : > { %4350 = vst [vmem:[#allocation29_spill] sm:$0xff] %v3554_v25  ;;  %v948_v0 = vsub.f32 %v4351_v11, %v3554_v25  ;;  %v949_v48 = vsub.f32 %v4352_v46, %v3554_v25  ;;  %1560 = vadd.xlane.f32.xlu1 %v1532_v24  ;;  %v4356_v24 = vld [vmem:[#allocation47_spill] sm:$0xff] }
 0x244   : > { %v3560_v13 = vpop.xlane.xlu1 %1542 }
 0x245   : > { %4353 = vst [vmem:[#allocation46_spill] sm:$0xff] %v3560_v13  ;;  %v2120_v26 = vpop.eup %2119  ;;  %v984_v27 = vmul.f32 1.442695, %v948_v0  ;;  %v986_v33 = vmul.f32 1.442695, %v949_v48  ;;  %v3573_v13 = vadd.f32 %v4356_v24, %v2894_v21  ;;  %v4359_v0 = vld [vmem:[#allocation8_spill] sm:$0xff] }
 0x246   : > { %1396 = vadd.xlane.f32.xlu0 %v2120_v26  ;;  %v3566_v34 = vpop.xlane.xlu0 %1239  ;;  %v4360_v48 = vunpack.c.l.bf16 %v4359_v0  ;;  %v4364_v24 = vld [vmem:[#allocation3_spill] sm:$0xff] }
 0x247   : > { %4355 = vst [vmem:[#allocation33_spill] sm:$0xff] %v3566_v34  ;;  %2123 = vpow2.f32 %v984_v27  ;;  %1626 = vmax.xlane.f32.xlu1 %v3564_v23  ;;  %4357 = vst [vmem:[#allocation47_spill] sm:$0xff] %v3573_v13  ;;  %v4365_v25 = vunpack.c.l.bf16 %v4364_v24  ;;  %v4366_v10 = vunpack.c.h.bf16 %v4364_v24 }
 0x248   : > { %2125 = vpow2.f32 %v986_v33  ;;  %v3569_v11 = vpop.xlane.xlu1 %906  ;;  %v1533_v26 = vmul.f32 %v4360_v48, %v3544_v57  ;;  %v4362_v33 = vld [vmem:[#allocation39_spill] sm:$0xff] }
 0x249   : > { %v2122_v46 = vpop.eup %2121  ;;  %v1226_v17 = vmul.f32 %v4365_v25, %v3573_v13  ;;  %v1227_v15 = vmul.f32 %v4366_v10, %v3577_v29  ;;  %v4371_v10 = vld [vmem:[#allocation43_spill] sm:$0xff] }
 0x24a   : > { %1684 = vadd.xlane.f32.xlu0 %v2122_v46  ;;  %v3582_v27 = vpop.xlane.xlu0 %1320  ;;  %v935_v46 = vmax.f32 %v3573_v13, %v3577_v29 }
 0x24b   : > { %4361 = vst [vmem:[#allocation8_spill] sm:$0xff] %v3582_v27  ;;  %v1348_v6 = vsub.f32 %v4362_v33, %v3582_v27  ;;  %1562 = vadd.xlane.f32.xlu1 %v1533_v26  ;;  %v1271_v25 = vadd.f32 %v1227_v15, %v1226_v17  ;;  %v4374_v15 = vld [vmem:[#allocation56_spill] sm:$0xff] }
 0x24c   : > { %v3586_v34 = vpop.xlane.xlu1 %1830 }
 0x24d   : > { %4363 = vst [vmem:[#allocation39_spill] sm:$0xff] %v3586_v34  ;;  %v1368_v19 = vmul.f32 1.442695, %v1348_v6  ;;  %v4370_v6 = vld [vmem:[#allocation42_spill] sm:$0xff] }
 0x24e   : > { %v3596_v0 = vpop.xlane.xlu0 %1608 }
 0x24f   : > { %4367 = vst [vmem:[#allocation3_spill] sm:$0xff] %v3596_v0  ;;  %2127 = vpow2.f32 %v1368_v19  ;;  %v1636_v48 = vsub.f32 %v3098_v39, %v3596_v0  ;;  %936 = vmax.xlane.f32.xlu1 %v935_v46  ;;  %v4372_v39 = vld [vmem:[#allocation17_spill] sm:$0xff] }
 0x250   : > { %v3600_v26 = vpop.xlane.xlu1 %1242  ;;  %v1345_v46 = vsub.f32 %v4372_v39, %v3469_v55 }
 0x251   : > { %4368 = vst [vmem:[#allocation87_spill] sm:$0xff] %v3600_v26  ;;  %v2124_v33 = vpop.eup %2123  ;;  %v1656_v34 = vmul.f32 1.442695, %v1636_v48  ;;  %v4373_v48 = vld [vmem:[#allocation23_spill] sm:$0xff]  ;;  %v3616_v26 = vadd.f32 %v4374_v15, %v2890_v44  ;;  %v3637_v15 = vadd.f32 %v3206_v60, %v2901_v3 }
 0x252   : > { %v2126_v27 = vpop.eup %2125  ;;  %v3602_v23 = vpop.xlane.xlu0 %909  ;;  %v1633_v17 = vsub.f32 %v4373_v48, %v3491_v40  ;;  %v4378_v48 = vld [vmem:[#allocation55_spill] sm:$0xff] }
 0x253   : > { %4369 = vst [vmem:[#allocation88_spill] sm:$0xff] %v3602_v23  ;;  %2129 = vpow2.f32 %v1656_v34  ;;  %v952_v24 = vsub.f32 %v4370_v6, %v3602_v23  ;;  %v953_v29 = vsub.f32 %v4371_v10, %v3602_v23  ;;  %1272 = vadd.xlane.f32.xlu1 %v1271_v25  ;;  %v1046_v19 = vadd.f32 %v2126_v27, %v2124_v33  ;;  %v4375_v6 = vld [vmem:[#allocation22_spill] sm:$0xff]  ;;  %v4377_v33 = vld [vmem:[#allocation24_spill] sm:$0xff] }
 0x254   : > { %v3610_v0 = vpop.xlane.xlu1 %1322  ;;  %v946_v10 = vsub.f32 %v4375_v6, %v3498_v53  ;;  %v1362_v27 = vmul.f32 1.442695, %v1345_v46  ;;  %v947_v39 = vsub.f32 %v4377_v33, %v3498_v53  ;;  %v3627_v23 = vadd.f32 %v4378_v48, %v2894_v21 }
 0x255   : > { %v992_v34 = vmul.f32 1.442695, %v952_v24  ;;  %v994_v13 = vmul.f32 1.442695, %v953_v29  ;;  %1047 = vadd.xlane.f32.xlu0 %v1046_v19  ;;  %v1650_v24 = vmul.f32 1.442695, %v1633_v17  ;;  %v3633_v19 = vadd.f32 %v3204_v50, %v2899_v32 }
 0x256   : > { %v3620_v25 = vpop.xlane.xlu0 %1245  ;;  %v980_v46 = vmul.f32 1.442695, %v946_v10  ;;  %v4381_v17 = vld [vmem:[#allocation4_spill] sm:$0xff] }
 0x257   : > { %4376 = vst [vmem:[#allocation42_spill] sm:$0xff] %v3620_v25  ;;  %2131 = vpow2.f32 %v992_v34  ;;  %1342 = vmax.xlane.f32.xlu1 %v3616_v26  ;;  %v4382_v6 = vunpack.c.l.bf16 %v4381_v17  ;;  %v4383_v3 = vunpack.c.h.bf16 %v4381_v17 }
 0x258   : > { %2133 = vpow2.f32 %v994_v13  ;;  %v3629_v44 = vpop.xlane.xlu1 %1544  ;;  %v982_v13 = vmul.f32 1.442695, %v947_v39 }
 0x259   : > { %4379 = vst [vmem:[#allocation43_spill] sm:$0xff] %v3629_v44  ;;  %v2128_v29 = vpop.eup %2127  ;;  %2135 = vpow2.f32 %v1362_v27  ;;  %v1230_v32 = vmul.f32 %v4382_v6, %v3627_v23  ;;  %v1231_v60 = vmul.f32 %v4383_v3, %v3633_v19  ;;  %v4384_v27 = vld [vmem:[#allocation28_spill] sm:$0xff] }
 0x25a   : > { %1400 = vadd.xlane.f32.xlu0 %v2128_v29  ;;  %v3639_v34 = vpop.xlane.xlu0 %1324  ;;  %2137 = vpow2.f32 %v1650_v24  ;;  %v1347_v39 = vsub.f32 %v4384_v27, %v3534_v8 }
 0x25b   : > { %4380 = vst [vmem:[#allocation17_spill] sm:$0xff] %v3639_v34  ;;  %v1350_v21 = vsub.f32 %v3159_v41, %v3639_v34  ;;  %1630 = vmax.xlane.f32.xlu1 %v3637_v15  ;;  %v941_v41 = vmax.f32 %v3627_v23, %v3633_v19  ;;  %2139 = vpow2.f32 %v980_v46  ;;  %v1277_v6 = vadd.f32 %v1231_v60, %v1230_v32  ;;  %v4387_v46 = vld [vmem:[#allocation30_spill] sm:$0xff]  ;;  %v4391_v32 = vld [vmem:[#allocation35_spill] sm:$0xff] }
 0x25c   : > { %v3647_v50 = vpop.xlane.xlu1 %1610  ;;  %v1366_v44 = vmul.f32 1.442695, %v1347_v39  ;;  %v1635_v34 = vsub.f32 %v4387_v46, %v3540_v5  ;;  %v951_v60 = vsub.f32 %v4391_v32, %v3569_v11 }
 0x25d   : > { %v2130_v33 = vpop.eup %2129  ;;  %v1372_v10 = vmul.f32 1.442695, %v1350_v21 }
 0x25e   : > { %1688 = vadd.xlane.f32.xlu0 %v2130_v33  ;;  %v3656_v48 = vpop.xlane.xlu0 %1612  ;;  %v4388_v33 = vld [vmem:[#allocation34_spill] sm:$0xff] }
 0x25f   : > { %4385 = vst [vmem:[#allocation23_spill] sm:$0xff] %v3656_v48  ;;  %2141 = vpow2.f32 %v1372_v10  ;;  %v1638_v29 = vsub.f32 %v3175_v7, %v3656_v48  ;;  %942 = vmax.xlane.f32.xlu1 %v941_v41  ;;  %v950_v27 = vsub.f32 %v4388_v33, %v3569_v11  ;;  %v4389_v7 = vld [vmem:[#allocation52_spill] sm:$0xff]  ;;  %v1654_v48 = vmul.f32 1.442695, %v1635_v34 }
 0x260   : > { %2143 = vpow2.f32 %v982_v13  ;;  %v3660_v24 = vpop.xlane.xlu1 %1832  ;;  %v4390_v13 = vld [vmem:[#allocation53_spill] sm:$0xff] }
 0x261   : > { %4386 = vst [vmem:[#allocation56_spill] sm:$0xff] %v3660_v24  ;;  %v2132_v17 = vpop.eup %2131  ;;  %v1660_v21 = vmul.f32 1.442695, %v1638_v29 }
 0x262   : > { %v2134_v3 = vpop.eup %2133  ;;  %v3666_v25 = vpop.xlane.xlu0 %915 }
 0x263   : > { %2145 = vpow2.f32 %v1660_v21  ;;  %v956_v10 = vsub.f32 %v4389_v7, %v3666_v25  ;;  %v957_v41 = vsub.f32 %v4390_v13, %v3666_v25  ;;  %1278 = vadd.xlane.f32.xlu1 %v1277_v6  ;;  %v1052_v29 = vadd.f32 %v2134_v3, %v2132_v17  ;;  %v2136_v33 = vpop.eup %2135 }
 0x264   : > { %v3674_v39 = vpop.xlane.xlu1 %1546  ;;  %2147 = vpow2.f32 %v1366_v44  ;;  %v2138_v5 = vpop.eup %2137  ;;  %v988_v7 = vmul.f32 1.442695, %v950_v27  ;;  %v990_v6 = vmul.f32 1.442695, %v951_v60 }
 0x265   : > { %v1000_v46 = vmul.f32 1.442695, %v956_v10  ;;  %v1002_v24 = vmul.f32 1.442695, %v957_v41  ;;  %1053 = vadd.xlane.f32.xlu0 %v1052_v29  ;;  %v2140_v13 = vpop.eup %2139  ;;  %v1349_v10 = vsub.f32 %v3144_v42, %v3610_v0 }
 0x266   : > { %v3676_v21 = vpop.xlane.xlu0 %1251 }
 0x267   : > { %2149 = vpow2.f32 %v1000_v46  ;;  %1394 = vadd.xlane.f32.xlu1 %v2136_v33  ;;  %v1370_v60 = vmul.f32 1.442695, %v1349_v10 }
 0x268   : > { %2151 = vpow2.f32 %v1002_v24  ;;  %v3678_v17 = vpop.xlane.xlu1 %912  ;;  %v1637_v24 = vsub.f32 %v3170_v22, %v3647_v50 }
 0x269   : > { %v2142_v3 = vpop.eup %2141  ;;  %2153 = vpow2.f32 %v1654_v48  ;;  %v954_v48 = vsub.f32 %v3212_v16, %v3678_v17  ;;  %v955_v46 = vsub.f32 %v3216_v36, %v3678_v17 }
 0x26a   : > { %v2144_v32 = vpop.eup %2143  ;;  %1404 = vadd.xlane.f32.xlu0 %v2142_v3  ;;  %v3682_v44 = vpop.xlane.xlu0 %1328  ;;  %2155 = vpow2.f32 %v988_v7 }
 0x26b   : > { %v1352_v34 = vsub.f32 %v3227_v62, %v3682_v44  ;;  %1682 = vadd.xlane.f32.xlu1 %v2138_v5  ;;  %2157 = vpow2.f32 %v990_v6  ;;  %v1043_v42 = vadd.f32 %v2144_v32, %v2140_v13  ;;  %v1658_v5 = vmul.f32 1.442695, %v1637_v24 }
 0x26c   : > { %v3688_v27 = vpop.xlane.xlu1 %1834  ;;  %v996_v16 = vmul.f32 1.442695, %v954_v48  ;;  %v998_v32 = vmul.f32 1.442695, %v955_v46 }
 0x26d   : > { %v2146_v41 = vpop.eup %2145  ;;  %v1376_v29 = vmul.f32 1.442695, %v1352_v34 }
 0x26e   : > { %1692 = vadd.xlane.f32.xlu0 %v2146_v41  ;;  %v3694_v33 = vpop.xlane.xlu0 %1616  ;;  %v2148_v22 = vpop.eup %2147 }
 0x26f   : > { %2159 = vpow2.f32 %v1376_v29  ;;  %v1640_v62 = vsub.f32 %v3242_v38, %v3694_v33  ;;  %1044 = vadd.xlane.f32.xlu1 %v1043_v42 }
 0x270   : > { %v3698_v7 = vpop.xlane.xlu1 %1248  ;;  %2161 = vpow2.f32 %v1370_v60 }
 0x271   : > { %v2150_v6 = vpop.eup %2149  ;;  %v1664_v3 = vmul.f32 1.442695, %v1640_v62 }
 0x272   : > { %v2152_v13 = vpop.eup %2151  ;;  %v3700_v10 = vpop.xlane.xlu0 %921 }
 0x273   : > { %2163 = vpow2.f32 %v1664_v3  ;;  %v960_v36 = vsub.f32 %v3246_v59, %v3700_v10  ;;  %v961_v38 = vsub.f32 %v3250_v35, %v3700_v10  ;;  %1398 = vadd.xlane.f32.xlu1 %v2148_v22  ;;  %v1058_v34 = vadd.f32 %v2152_v13, %v2150_v6  ;;  %v2154_v24 = vpop.eup %2153 }
 0x274   : > { %2165 = vpow2.f32 %v1658_v5  ;;  %v3706_v41 = vpop.xlane.xlu1 %1326  ;;  %v2156_v48 = vpop.eup %2155 }
 0x275   : > { %2167 = vpow2.f32 %v996_v16  ;;  %v1008_v29 = vmul.f32 1.442695, %v960_v36  ;;  %v1010_v42 = vmul.f32 1.442695, %v961_v38  ;;  %1059 = vadd.xlane.f32.xlu0 %v1058_v34  ;;  %v2158_v60 = vpop.eup %2157  ;;  %v1351_v59 = vsub.f32 %v3266_v4, %v3706_v41 }
 0x276   : > { %2169 = vpow2.f32 %v998_v32  ;;  %v3708_v46 = vpop.xlane.xlu0 %1840  ;;  %v1049_v22 = vadd.f32 %v2158_v60, %v2156_v48 }
 0x277   : > { %4392 = vst [vmem:[#allocation22_spill] sm:$0xff] %v3708_v46  ;;  %2171 = vpow2.f32 %v1008_v29  ;;  %1686 = vadd.xlane.f32.xlu1 %v2154_v24  ;;  %v1374_v16 = vmul.f32 1.442695, %v1351_v59 }
 0x278   : > { %2173 = vpow2.f32 %v1010_v42  ;;  %v3712_v35 = vpop.xlane.xlu1 %1548 }
 0x279   : > { %v2160_v62 = vpop.eup %2159  ;;  %2175 = vpow2.f32 %v1374_v16 }
 0x27a   : > { %1408 = vadd.xlane.f32.xlu0 %v2160_v62  ;;  %v3714_v5 = vpop.xlane.xlu0 %1554  ;;  %v2162_v6 = vpop.eup %2161 }
 0x27b   : > { %4393 = vst [vmem:[#allocation24_spill] sm:$0xff] %v3714_v5  ;;  %1050 = vadd.xlane.f32.xlu1 %v1049_v22 }
 0x27c   : > { %v3716_v3 = vpop.xlane.xlu1 %1614 }
 0x27d   : > { %v2164_v13 = vpop.eup %2163  ;;  %v1639_v32 = vsub.f32 %v3294_v31, %v3716_v3 }
 0x27e   : > { %v2166_v36 = vpop.eup %2165  ;;  %1696 = vadd.xlane.f32.xlu0 %v2164_v13  ;;  %v3720_v38 = vpop.xlane.xlu0 %1257 }
 0x27f   : > { %4394 = vst [vmem:[#allocation55_spill] sm:$0xff] %v3720_v38  ;;  %v2168_v4 = vpop.eup %2167  ;;  %1402 = vadd.xlane.f32.xlu1 %v2162_v6  ;;  %v1662_v24 = vmul.f32 1.442695, %v1639_v32 }
 0x280   : > { %v2170_v34 = vpop.eup %2169  ;;  %v3722_v48 = vpop.xlane.xlu1 %1836 }
 0x281   : > { %v2172_v29 = vpop.eup %2171  ;;  %2177 = vpow2.f32 %v1662_v24  ;;  %v1055_v6 = vadd.f32 %v2170_v34, %v2168_v4 }
 0x282   : > { %v2174_v42 = vpop.eup %2173  ;;  %v3724_v60 = vpop.xlane.xlu0 %1332 }
 0x283   : > { %v1354_v59 = vsub.f32 %v3303_v47, %v3724_v60  ;;  %1690 = vadd.xlane.f32.xlu1 %v2166_v36  ;;  %v1064_v31 = vadd.f32 %v2174_v42, %v2172_v29  ;;  %v2176_v24 = vpop.eup %2175 }
 0x284   : > { %v3728_v62 = vpop.xlane.xlu1 %1550 }
 0x285   : > { %v1380_v22 = vmul.f32 1.442695, %v1354_v59  ;;  %1065 = vadd.xlane.f32.xlu0 %v1064_v31 }
 0x286   : > { %v3730_v13 = vpop.xlane.xlu0 %1620 }
 0x287   : > { %4395 = vst [vmem:[#allocation4_spill] sm:$0xff] %v3730_v13  ;;  %2179 = vpow2.f32 %v1380_v22  ;;  %v1642_v16 = vsub.f32 %v3321_v58, %v3730_v13  ;;  %1056 = vadd.xlane.f32.xlu1 %v1055_v6 }
 0x288   : > { %v3734_v32 = vpop.xlane.xlu1 %918 }
 0x289   : > { %v1668_v5 = vmul.f32 1.442695, %v1642_v16  ;;  %v958_v47 = vsub.f32 %v3310_v49, %v3734_v32  ;;  %v959_v36 = vsub.f32 %v3314_v9, %v3734_v32 }
 0x28a   : > { %v3740_v29 = vpop.xlane.xlu0 %927 }
 0x28b   : > { %2181 = vpow2.f32 %v1668_v5  ;;  %v1004_v4 = vmul.f32 1.442695, %v958_v47  ;;  %v1006_v34 = vmul.f32 1.442695, %v959_v36  ;;  %1406 = vadd.xlane.f32.xlu1 %v2176_v24  ;;  %v2178_v58 = vpop.eup %2177 }
 0x28c   : > { %v3742_v42 = vpop.xlane.xlu1 %1838 }
 0x28d   : > { %4396 = vst [vmem:[#allocation28_spill] sm:$0xff] %v3742_v42  ;;  %2183 = vpow2.f32 %v1004_v4 }
 0x28e   : > { %2185 = vpow2.f32 %v1006_v34  ;;  %v3744_v59 = vpop.xlane.xlu0 %1263 }
 0x28f   : > { %4397 = vst [vmem:[#allocation30_spill] sm:$0xff] %v3744_v59  ;;  %1694 = vadd.xlane.f32.xlu1 %v2178_v58 }
 0x290   : > { %v3746_v31 = vpop.xlane.xlu1 %1254 }
 0x291   : > { %v2180_v49 = vpop.eup %2179 }
 0x292   : > { %1412 = vadd.xlane.f32.xlu0 %v2180_v49  ;;  %v3748_v9 = vpop.xlane.xlu0 %1336 }
 0x293   : > { %4398 = vst [vmem:[#allocation34_spill] sm:$0xff] %v3748_v9 }
 0x294   : > { %v3750_v22 = vpop.xlane.xlu1 %1330 }
 0x295   : > { %v2182_v5 = vpop.eup %2181  ;;  %v1353_v6 = vsub.f32 %v3270_v45, %v3750_v22 }
 0x296   : > { %1700 = vadd.xlane.f32.xlu0 %v2182_v5  ;;  %v3754_v16 = vpop.xlane.xlu0 %1624 }
 0x297   : > { %4399 = vst [vmem:[#allocation52_spill] sm:$0xff] %v3754_v16  ;;  %v2184_v47 = vpop.eup %2183  ;;  %v1378_v36 = vmul.f32 1.442695, %v1353_v6 }
 0x298   : > { %v2186_v24 = vpop.eup %2185  ;;  %v3756_v4 = vpop.xlane.xlu1 %1552 }
 0x299   : > { %2187 = vpow2.f32 %v1378_v36  ;;  %v1061_v34 = vadd.f32 %v2186_v24, %v2184_v47 }
 0x29a   : > { %v3758_v58 = vpop.xlane.xlu0 %933 }
 0x29b   : > { %4400 = vst [vmem:[#allocation53_spill] sm:$0xff] %v3758_v58  ;;  %1062 = vadd.xlane.f32.xlu1 %v1061_v34 }
 0x29c   : > { %v3760_v49 = vpop.xlane.xlu1 %1618 }
 0x29d   : > { %4401 = vst [vmem:[#allocation35_spill] sm:$0xff] %v3760_v49  ;;  %v1641_v59 = vsub.f32 %v3402_v61, %v3760_v49 }
 0x29e   : > { %v3764_v45 = vpop.xlane.xlu0 %1269 }
 0x29f   : > { %v1666_v13 = vmul.f32 1.442695, %v1641_v59  ;;  %4402 = vst [vmem:[#allocation89_spill] sm:$0xff] %v3764_v45 }
 0x2a0   : > { %v3766_v5 = vpop.xlane.xlu1 %924 }
 0x2a1   : > { %2189 = vpow2.f32 %v1666_v13  ;;  %v962_v6 = vsub.f32 %v3406_v37, %v3766_v5  ;;  %v963_v47 = vsub.f32 %v3410_v30, %v3766_v5 }
 0x2a2   : > { %v3774_v61 = vpop.xlane.xlu0 %1340 }
 0x2a3   : > { %v2188_v36 = vpop.eup %2187  ;;  %v1012_v24 = vmul.f32 1.442695, %v962_v6  ;;  %v1014_v34 = vmul.f32 1.442695, %v963_v47  ;;  %4404 = vst [vmem:[#allocation91_spill] sm:$0xff] %v3774_v61  ;;  %v964_v6 = vsub.f32 %v3328_v20, %v3740_v29 }
 0x2a4   : > { %v3772_v46 = vpop.xlane.xlu1 %1842  ;;  %1410 = vadd.xlane.f32.xlu1 %v2188_v36 }
 0x2a5   : > { %4403 = vst [vmem:[#allocation90_spill] sm:$0xff] %v3772_v46  ;;  %2191 = vpow2.f32 %v1012_v24  ;;  %v965_v24 = vsub.f32 %v3332_v12, %v3740_v29  ;;  %v1016_v42 = vmul.f32 1.442695, %v964_v6  ;;  %v1356_v12 = vsub.f32 %v3364_v2, %v3748_v9 }
 0x2a6   : > { %2193 = vpow2.f32 %v1014_v34  ;;  %v3778_v13 = vpop.xlane.xlu0 %1628 }
 0x2a7   : > { %4406 = vst [vmem:[#allocation93_spill] sm:$0xff] %v3778_v13 }
 0x2a8   : > { %v3776_v59 = vpop.xlane.xlu1 %1260 }
 0x2a9   : > { %4405 = vst [vmem:[#allocation92_spill] sm:$0xff] %v3776_v59 }
 0x2aa   : > { %v3790_v46 = vpop.xlane.xlu0 %939 }
 0x2ab   : > { %v2190_v45 = vpop.eup %2189  ;;  %4408 = vst [vmem:[#allocation95_spill] sm:$0xff] %v3790_v46 }
 0x2ac   : > { %v3780_v49 = vpop.xlane.xlu1 %1334  ;;  %1698 = vadd.xlane.f32.xlu1 %v2190_v45  ;;  %v1018_v45 = vmul.f32 1.442695, %v965_v24 }
 0x2ad   : > { %4407 = vst [vmem:[#allocation94_spill] sm:$0xff] %v3780_v49  ;;  %v1355_v37 = vsub.f32 %v3462_v43, %v3780_v49 }
 0x2ae   : > { %v3796_v20 = vpop.xlane.xlu0 %1275 }
 0x2af   : > { %v2192_v30 = vpop.eup %2191  ;;  %v1382_v47 = vmul.f32 1.442695, %v1355_v37  ;;  %4410 = vst [vmem:[#allocation97_spill] sm:$0xff] %v3796_v20 }
 0x2b0   : > { %v2194_v36 = vpop.eup %2193  ;;  %v3788_v34 = vpop.xlane.xlu1 %1556 }
 0x2b1   : > { %2195 = vpow2.f32 %v1382_v47  ;;  %v1067_v59 = vadd.f32 %v2194_v36, %v2192_v30  ;;  %v1644_v47 = vsub.f32 %v3371_v56, %v3754_v16 }
 0x2b2   : > { %2197 = vpow2.f32 %v1016_v42 }
 0x2b3   : > { %1068 = vadd.xlane.f32.xlu1 %v1067_v59  ;;  %2199 = vpow2.f32 %v1018_v45  ;;  %v1384_v59 = vmul.f32 1.442695, %v1356_v12  ;;  %v1672_v42 = vmul.f32 1.442695, %v1644_v47 }
 0x2b4   : > { %v3792_v38 = vpop.xlane.xlu1 %1622 }
 0x2b5   : > { %4409 = vst [vmem:[#allocation96_spill] sm:$0xff] %v3792_v38  ;;  %v1643_v43 = vsub.f32 %v3482_v52, %v3792_v38  ;;  %v4464_v38 = vld [vmem:[#allocation3_spill] sm:$0xff] }
 0x2b7   : > { %v1670_v37 = vmul.f32 1.442695, %v1643_v43 }
 0x2b8   : > { %v3800_v49 = vpop.xlane.xlu1 %1844 }
 0x2b9   : > { %4411 = vst [vmem:[#allocation98_spill] sm:$0xff] %v3800_v49  ;;  %2201 = vpow2.f32 %v1670_v37 }
 0x2bb   : > { %v2196_v30 = vpop.eup %2195  ;;  %v1393_v6 = vpop.xlane.xlu0 %1392 }
 0x2bc   : > { %v3804_v36 = vpop.xlane.xlu1 %1558  ;;  %1414 = vadd.xlane.f32.xlu1 %v2196_v30  ;;  %2203 = vlog2.f32 %v1393_v6  ;;  %v2198_v45 = vpop.eup %2197 }
 0x2bd   : > { %4412 = vst [vmem:[#allocation99_spill] sm:$0xff] %v3804_v36  ;;  %2205 = vpow2.f32 %v1384_v59  ;;  %v2200_v37 = vpop.eup %2199 }
 0x2be   : > { %v1070_v59 = vadd.f32 %v2200_v37, %v2198_v45 }
 0x2bf   : > { %v1681_v52 = vpop.xlane.xlu0 %1680 }
 0x2c0   : > { %v3806_v24 = vpop.xlane.xlu1 %930  ;;  %2207 = vlog2.f32 %v1681_v52 }
 0x2c1   : > { %v966_v2 = vsub.f32 %v3502_v28, %v3806_v24  ;;  %v967_v43 = vsub.f32 %v3506_v18, %v3806_v24  ;;  %2209 = vpow2.f32 %v1672_v42 }
 0x2c3   : > { %v2202_v12 = vpop.eup %2201  ;;  %v1020_v20 = vmul.f32 1.442695, %v966_v2  ;;  %v1022_v16 = vmul.f32 1.442695, %v967_v43 }
 0x2c4   : > { %v3812_v30 = vpop.xlane.xlu1 %1846  ;;  %1702 = vadd.xlane.f32.xlu0 %v2202_v12  ;;  %v969_v12 = vsub.f32 %v3379_v1, %v3758_v58 }
 0x2c5   : > { %4413 = vst [vmem:[#allocation100_spill] sm:$0xff] %v3812_v30  ;;  %2211 = vpow2.f32 %v1020_v20 }
 0x2c6   : > { %2213 = vpow2.f32 %v1022_v16  ;;  %v1042_v6 = vpop.xlane.xlu0 %1041  ;;  %v2204_v28 = vpop.eup %2203  ;;  %v968_v16 = vsub.f32 %v3375_v54, %v3758_v58  ;;  %v4417_v54 = vld [vmem:[#allocation26_spill] sm:$0xff] }
 0x2c7   : > { %2215 = vlog2.f32 %v1042_v6  ;;  %v2206_v52 = vpop.eup %2205  ;;  %v1425_v18 = vmul.f32 0.6931472, %v2204_v28 }
 0x2c8   : > { %v3814_v47 = vpop.xlane.xlu1 %1266  ;;  %1071 = vadd.xlane.f32.xlu0 %v1070_v59  ;;  %v1024_v30 = vmul.f32 1.442695, %v968_v16 }
 0x2c9   : > { %4414 = vst [vmem:[#allocation101_spill] sm:$0xff] %v3814_v47  ;;  %v1456_v6 = vadd.f32 %v1425_v18, %v3464_v63  ;;  %v4419_v63 = vld [vmem:[#allocation32_spill] sm:$0xff] }
 0x2ca   : > { %v2208_v36 = vpop.eup %2207 }
 0x2cb   : > { %v2210_v2 = vpop.eup %2209  ;;  %v1713_v43 = vmul.f32 0.6931472, %v2208_v36 }
 0x2cc   : > { %v3816_v49 = vpop.xlane.xlu1 %1338  ;;  %1416 = vadd.xlane.f32.xlu0 %v2206_v52 }
 0x2cd   : > { %4415 = vst [vmem:[#allocation102_spill] sm:$0xff] %v3816_v49  ;;  %v1357_v42 = vsub.f32 %v3544_v57, %v3816_v49  ;;  %v1744_v57 = vadd.f32 %v1713_v43, %v3474_v51  ;;  %v1026_v49 = vmul.f32 1.442695, %v969_v12  ;;  %v4422_v43 = vld [vmem:[#allocation78_spill] sm:$0xff] }
 0x2ce   : > { %v1358_v16 = vsub.f32 %v4422_v43, %v3774_v61  ;;  %v4443_v61 = vld [vmem:[#allocation11_spill] sm:$0xff] }
 0x2cf   : > { %v2212_v20 = vpop.eup %2211  ;;  %v1386_v45 = vmul.f32 1.442695, %v1357_v42  ;;  %v1504_v42 = vmul.f32 %v4417_v54, %v1456_v6  ;;  %v4424_v6 = vld [vmem:[#allocation18_spill] sm:$0xff] }
 0x2d0   : > { %v2214_v37 = vpop.eup %2213  ;;  %v3825_v59 = vpop.xlane.xlu1 %1560  ;;  %1704 = vadd.xlane.f32.xlu0 %v2210_v2  ;;  %v4420_v2 = vld [vmem:[#allocation77_spill] sm:$0xff] }
 0x2d1   : > { %4416 = vst [vmem:[#allocation103_spill] sm:$0xff] %v3825_v59  ;;  %v2216_v28 = vpop.eup %2215  ;;  %2217 = vpow2.f32 %v1386_v45  ;;  %v1073_v52 = vadd.f32 %v2214_v37, %v2212_v20  ;;  %v1792_v59 = vmul.f32 %v4420_v2, %v1744_v57  ;;  %v4421_v45 = vld [vmem:[#allocation10_spill] sm:$0xff]  ;;  %v4423_v37 = vld [vmem:[#allocation16_spill] sm:$0xff]  ;;  %v4429_v2 = vld [vmem:[#allocation47_spill] sm:$0xff] }
 0x2d2   : > { %v1089_v36 = vmul.f32 0.6931472, %v2216_v28  ;;  %2219 = vpow2.f32 %v1024_v30  ;;  %v1568_v12 = vsub.f32 %v1504_v42, %v4423_v37 }
 0x2d3   : > { %1074 = vadd.xlane.f32.xlu1 %v1073_v52  ;;  %v1397_v9 = vpop.xlane.xlu0 %1396  ;;  %2221 = vpow2.f32 %v1026_v49  ;;  %v4426_v52 = vld [vmem:[#allocation5_spill] sm:$0xff] }
 0x2d4   : > { %v1120_v47 = vadd.f32 %v1089_v36, %v3484_v14  ;;  %v3830_v1 = vpop.xlane.xlu1 %1626  ;;  %v1856_v36 = vsub.f32 %v1792_v59, %v4426_v52 }
 0x2d5   : > { %4418 = vst [vmem:[#allocation26_spill] sm:$0xff] %v3830_v1  ;;  %v1645_v18 = vsub.f32 %v4419_v63, %v3830_v1 }
 0x2d6   : > { %v1184_v20 = vmul.f32 %v4421_v45, %v1120_v47  ;;  %v1388_v47 = vmul.f32 1.442695, %v1358_v16 }
 0x2d7   : > { %v1674_v51 = vmul.f32 1.442695, %v1645_v18  ;;  %v1685_v1 = vpop.xlane.xlu0 %1684  ;;  %v4428_v18 = vld [vmem:[#allocation81_spill] sm:$0xff] }
 0x2d8   : > { %v1280_v14 = vsub.f32 %v1184_v20, %v4424_v6  ;;  %v3840_v28 = vpop.xlane.xlu1 %1562  ;;  %v1646_v42 = vsub.f32 %v4428_v18, %v3778_v13  ;;  %v4430_v20 = vld [vmem:[#allocation86_spill] sm:$0xff] }
 0x2d9   : > { %4425 = vst [vmem:[#allocation32_spill] sm:$0xff] %v3840_v28  ;;  %2223 = vpow2.f32 %v1674_v51 }
 0x2da   : > { %v1584_v54 = vadd.f32 %v1568_v12, %v1280_v14  ;;  %2225 = vlog2.f32 %v1397_v9  ;;  %v1676_v12 = vmul.f32 1.442695, %v1646_v42 }
 0x2db   : > { %v2218_v57 = vpop.eup %2217  ;;  %2227 = vlog2.f32 %v1685_v1  ;;  %v4432_v1 = vld [vmem:[#allocation82_spill] sm:$0xff] }
 0x2dc   : > { %v3843_v30 = vadd.f32 %v1856_v36, %v1584_v54  ;;  %v3845_v49 = vpop.xlane.xlu1 %936  ;;  %1418 = vadd.xlane.f32.xlu1 %v2218_v57  ;;  %2229 = vpow2.f32 %v1388_v47  ;;  %v2220_v16 = vpop.eup %2219  ;;  %v972_v36 = vsub.f32 %v4432_v1, %v3790_v46  ;;  %v4433_v54 = vld [vmem:[#allocation83_spill] sm:$0xff] }
 0x2dd   : > { %4427 = vst [vmem:[#allocation77_spill] sm:$0xff] %v3845_v49  ;;  %v970_v45 = vsub.f32 %v4429_v2, %v3845_v49  ;;  %v971_v59 = vsub.f32 %v4430_v20, %v3845_v49  ;;  %v2222_v6 = vpop.eup %2221  ;;  %v973_v57 = vsub.f32 %v4433_v54, %v3790_v46 }
 0x2df   : > { %v1028_v51 = vmul.f32 1.442695, %v970_v45  ;;  %v1030_v37 = vmul.f32 1.442695, %v971_v59  ;;  %v1076_v45 = vadd.f32 %v2222_v6, %v2220_v16  ;;  %v1032_v59 = vmul.f32 1.442695, %v972_v36 }
 0x2e0   : > { %v3853_v9 = vpop.xlane.xlu1 %1272  ;;  %v4436_v16 = vld [vmem:[#allocation38_spill] sm:$0xff] }
 0x2e1   : > { %4431 = vst [vmem:[#allocation10_spill] sm:$0xff] %v3853_v9  ;;  %2231 = vpow2.f32 %v1028_v51 }
 0x2e2   : > { %2233 = vpow2.f32 %v1030_v37  ;;  %v1048_v14 = vpop.xlane.xlu0 %1047  ;;  %v1034_v37 = vmul.f32 1.442695, %v973_v57 }
 0x2e3   : > { %v2224_v52 = vpop.eup %2223  ;;  %2235 = vlog2.f32 %v1048_v14 }
 0x2e4   : > { %v3859_v2 = vpop.xlane.xlu1 %1342  ;;  %1706 = vadd.xlane.f32.xlu0 %v2224_v52  ;;  %v2226_v47 = vpop.eup %2225  ;;  %2237 = vpow2.f32 %v1676_v12 }
 0x2e5   : > { %4434 = vst [vmem:[#allocation78_spill] sm:$0xff] %v3859_v2  ;;  %v1359_v42 = vsub.f32 %v3616_v26, %v3859_v2  ;;  %v2228_v20 = vpop.eup %2227  ;;  %v1429_v13 = vmul.f32 0.6931472, %v2226_v47  ;;  %v4440_v2 = vld [vmem:[#allocation29_spill] sm:$0xff] }
 0x2e6   : > { %v2230_v1 = vpop.eup %2229  ;;  %v1717_v52 = vmul.f32 0.6931472, %v2228_v20  ;;  %v4438_v20 = vld [vmem:[#allocation41_spill] sm:$0xff] }
 0x2e7   : > { %v1390_v51 = vmul.f32 1.442695, %v1359_v42  ;;  %v1458_v6 = vadd.f32 %v1429_v13, %v4436_v16  ;;  %v4439_v13 = vld [vmem:[#allocation31_spill] sm:$0xff] }
 0x2e8   : > { %v3863_v28 = vpop.xlane.xlu1 %1630  ;;  %1077 = vadd.xlane.f32.xlu0 %v1076_v45 }
 0x2e9   : > { %4435 = vst [vmem:[#allocation16_spill] sm:$0xff] %v3863_v28  ;;  %2239 = vpow2.f32 %v1390_v51  ;;  %v1647_v14 = vsub.f32 %v3637_v15, %v3863_v28  ;;  %v1746_v51 = vadd.f32 %v1717_v52, %v4438_v20  ;;  %v1506_v16 = vmul.f32 %v4439_v13, %v1458_v6  ;;  %v4444_v52 = vld [vmem:[#allocation2_spill] sm:$0xff]  ;;  %v4446_v6 = vld [vmem:[#allocation27_spill] sm:$0xff] }
 0x2ea   : > { %2241 = vpow2.f32 %v1032_v59 }
 0x2eb   : > { %v2232_v54 = vpop.eup %2231  ;;  %v1678_v12 = vmul.f32 1.442695, %v1647_v14  ;;  %2243 = vpow2.f32 %v1034_v37 }
 0x2ec   : > { %v2234_v46 = vpop.eup %2233  ;;  %v3868_v36 = vpop.xlane.xlu1 %942  ;;  %1420 = vadd.xlane.f32.xlu0 %v2230_v1 }
 0x2ed   : > { %4437 = vst [vmem:[#allocation18_spill] sm:$0xff] %v3868_v36  ;;  %v2236_v57 = vpop.eup %2235  ;;  %2245 = vpow2.f32 %v1678_v12  ;;  %v974_v47 = vsub.f32 %v3627_v23, %v3868_v36  ;;  %v975_v42 = vsub.f32 %v3633_v19, %v3868_v36  ;;  %v1079_v45 = vadd.f32 %v2234_v46, %v2232_v54  ;;  %v4442_v23 = vld [vmem:[#allocation80_spill] sm:$0xff] }
 0x2ee   : > { %v1093_v59 = vmul.f32 0.6931472, %v2236_v57  ;;  %v2238_v14 = vpop.eup %2237  ;;  %v1794_v12 = vmul.f32 %v4442_v23, %v1746_v51  ;;  %v1570_v54 = vsub.f32 %v1506_v16, %v4444_v52  ;;  %v4445_v57 = vld [vmem:[#allocation33_spill] sm:$0xff]  ;;  %v4447_v52 = vld [vmem:[#allocation7_spill] sm:$0xff] }
 0x2ef   : > { %v1036_v28 = vmul.f32 1.442695, %v974_v47  ;;  %v1038_v37 = vmul.f32 1.442695, %v975_v42  ;;  %1080 = vadd.xlane.f32.xlu1 %v1079_v45  ;;  %v2335_v23 = vld [vmem:[%s2572_s11 + $0xd8] sm:$0xff] }
 0x2f0   : > { %v1122_v1 = vadd.f32 %v1093_v59, %v4440_v2  ;;  %v3877_v9 = vpop.xlane.xlu1 %1278  ;;  %1708 = vadd.xlane.f32.xlu0 %v2238_v14  ;;  %v1858_v20 = vsub.f32 %v1794_v12, %v4446_v6  ;;  %v831_v12 = vld [vmem:[%s2572_s11 + $0xf8] sm:$0xff] }
 0x2f1   : > { %4441 = vst [vmem:[#allocation5_spill] sm:$0xff] %v3877_v9  ;;  %2247 = vpow2.f32 %v1036_v28  ;;  %v4449_v6 = vld [vmem:[#allocation9_spill] sm:$0xff] }
 0x2f2   : > { %v1186_v19 = vmul.f32 %v4443_v61, %v1122_v1  ;;  %2249 = vpow2.f32 %v1038_v37  ;;  %v4459_v9 = vld [vmem:[#allocation45_spill] sm:$0xff] }
 0x2f3   : > { %v2240_v46 = vpop.eup %2239 }
 0x2f4   : > { %v1282_v47 = vsub.f32 %v1186_v19, %v4445_v57  ;;  %1422 = vadd.xlane.f32.xlu1 %v2240_v46  ;;  %v1395_v42 = vpop.xlane.xlu1 %1394  ;;  %v2242_v45 = vpop.eup %2241  ;;  %v887_v19 = vunpack.c.h.bf16 %v2335_v23 }
 0x2f5   : > { %2251 = vlog2.f32 %v1395_v42  ;;  %v2244_v2 = vpop.eup %2243  ;;  %v894_v42 = vunpack.c.l.bf16 %v831_v12 }
 0x2f6   : > { %v1586_v59 = vadd.f32 %v1570_v54, %v1282_v47  ;;  %v1082_v61 = vadd.f32 %v2244_v2, %v2242_v45  ;;  %v4448_v54 = vunpack.c.h.bf16 %v4447_v52 }
 0x2f7   : > { %v2246_v28 = vpop.eup %2245  ;;  %v1535_v52 = vmul.f32 %v894_v42, %v3616_v26 }
 0x2f8   : > { %v1874_v51 = vadd.f32 %v1858_v20, %v1586_v59  ;;  %v1683_v14 = vpop.xlane.xlu1 %1682  ;;  %1710 = vadd.xlane.f32.xlu0 %v2246_v28  ;;  %v1820_v57 = vmul.f32 %v4448_v54, %v3371_v56  ;;  %v4450_v20 = vunpack.c.l.bf16 %v4449_v6  ;;  %v2336_v28 = vld [vmem:[%s2572_s11 + $0xe8] sm:$0xff]  ;;  %v1821_v56 = vmul.f32 %v887_v19, %v4419_v63  ;;  %v4456_v63 = vld [vmem:[#allocation40_spill] sm:$0xff] }
 0x2f9   : > { %2253 = vlog2.f32 %v1683_v14  ;;  %v891_v14 = vunpack.c.h.bf16 %v2336_v28 }
 0x2fa   : > { %v1534_v59 = vmul.f32 %v4450_v20, %v4422_v43  ;;  %v4452_v43 = vld [vmem:[#allocation54_spill] sm:$0xff] }
 0x2fb   : > { %v2248_v37 = vpop.eup %2247  ;;  %v1822_v20 = vmul.f32 %v891_v14, %v4428_v18 }
 0x2fc   : > { %v2250_v13 = vpop.eup %2249  ;;  %v1045_v16 = vpop.xlane.xlu1 %1044  ;;  %1083 = vadd.xlane.f32.xlu0 %v1082_v61 }
 0x2fd   : > { %2255 = vlog2.f32 %v1045_v16  ;;  %v1085_v1 = vadd.f32 %v2250_v13, %v2248_v37 }
 0x2ff   : > { %v2252_v46 = vpop.eup %2251  ;;  %1086 = vadd.xlane.f32.xlu1 %v1085_v1  ;;  %v4451_v1 = vld [vmem:[#allocation65_spill] sm:$0xff] }
 0x300   : > { %1786 = vadd.xlane.f32.xlu0 %v887_v19  ;;  %v1427_v47 = vmul.f32 0.6931472, %v2252_v46 }
 0x302   : > { %v1457_v61 = vadd.f32 %v1427_v47, %v3469_v55  ;;  %v895_v55 = vunpack.c.h.bf16 %v831_v12  ;;  %v4454_v47 = vld [vmem:[#allocation20_spill] sm:$0xff]  ;;  %v1401_v12 = vpop.xlane.xlu0 %1400 }
 0x303   : > { %v2254_v45 = vpop.eup %2253  ;;  %1848 = vadd.xlane.f32.xlu1 %v1820_v57  ;;  %v4453_v57 = vld [vmem:[#allocation37_spill] sm:$0xff]  ;;  %2257 = vlog2.f32 %v1401_v12 }
 0x304   : > { %v1715_v2 = vmul.f32 0.6931472, %v2254_v45  ;;  %1502 = vadd.xlane.f32.xlu0 %v894_v42  ;;  %v1505_v23 = vmul.f32 %v4451_v1, %v1457_v61 }
 0x306   : > { %v1745_v13 = vadd.f32 %v1715_v2, %v3491_v40  ;;  %v1569_v6 = vsub.f32 %v1505_v23, %v4454_v47  ;;  %v4455_v40 = vld [vmem:[#allocation19_spill] sm:$0xff]  ;;  %v1689_v61 = vpop.xlane.xlu0 %1688 }
 0x307   : > { %v2256_v37 = vpop.eup %2255  ;;  %1564 = vadd.xlane.f32.xlu1 %v1534_v59 }
 0x308   : > { %v1091_v16 = vmul.f32 0.6931472, %v2256_v37  ;;  %1788 = vadd.xlane.f32.xlu0 %v891_v14  ;;  %v1793_v54 = vmul.f32 %v4452_v43, %v1745_v13  ;;  %v1399_v13 = vpop.xlane.xlu1 %1398 }
 0x30a   : > { %v1121_v46 = vadd.f32 %v1091_v16, %v3498_v53  ;;  %v1857_v19 = vsub.f32 %v1793_v54, %v4456_v63  ;;  %v1823_v53 = vmul.f32 %v895_v55, %v3637_v15  ;;  %v1054_v37 = vpop.xlane.xlu0 %1053 }
 0x30b   : > { %1850 = vadd.xlane.f32.xlu1 %v1821_v56 }
 0x30c   : > { %v1185_v45 = vmul.f32 %v4453_v57, %v1121_v46  ;;  %1566 = vadd.xlane.f32.xlu0 %v1535_v52  ;;  %v1687_v56 = vpop.xlane.xlu1 %1686 }
 0x30d   : > { %v2258_v47 = vpop.eup %2257 }
 0x30e   : > { %v1281_v2 = vsub.f32 %v1185_v45, %v4455_v40  ;;  %v1405_v16 = vpop.xlane.xlu0 %1404 }
 0x30f   : > { %1790 = vadd.xlane.f32.xlu1 %v895_v55 }
 0x310   : > { %v1585_v59 = vadd.f32 %v1569_v6, %v1281_v2  ;;  %1852 = vadd.xlane.f32.xlu0 %v1822_v20  ;;  %v1051_v14 = vpop.xlane.xlu1 %1050 }
 0x311   : > { %2259 = vlog2.f32 %v1051_v14  ;;  %v4458_v14 = vld [vmem:[#allocation8_spill] sm:$0xff] }
 0x312   : > { %v1873_v26 = vadd.f32 %v1857_v19, %v1585_v59  ;;  %v1693_v18 = vpop.xlane.xlu0 %1692  ;;  %2261 = vlog2.f32 %v1054_v37 }
 0x313   : > { %1854 = vadd.xlane.f32.xlu1 %v1823_v53  ;;  %2263 = vlog2.f32 %v1399_v13  ;;  %v1433_v53 = vmul.f32 0.6931472, %v2258_v47 }
 0x314   : > { %v1888_v42 = vadd.f32 %v1873_v26, %v3843_v30  ;;  %v1403_v46 = vpop.xlane.xlu1 %1402  ;;  %2265 = vlog2.f32 %v1687_v56 }
 0x315   : > { %2267 = vlog2.f32 %v1689_v61 }
 0x316   : > { %v3907_v28 = vadd.f32 %v1888_v42, %v1874_v51  ;;  %v1060_v1 = vpop.xlane.xlu0 %1059  ;;  %2269 = vlog2.f32 %v1405_v16  ;;  %v4457_v16 = vld [vmem:[#allocation88_spill] sm:$0xff] }
 0x318   : > { %v1691_v43 = vpop.xlane.xlu1 %1690 }
 0x31a   : > { %v1409_v23 = vpop.xlane.xlu0 %1408 }
 0x31b   : > { %v2260_v6 = vpop.eup %2259 }
 0x31c   : > { %v1057_v54 = vpop.xlane.xlu1 %1056  ;;  %v2262_v40 = vpop.eup %2261  ;;  %v1095_v63 = vmul.f32 0.6931472, %v2260_v6 }
 0x31d   : > { %2271 = vlog2.f32 %v1057_v54  ;;  %v2264_v20 = vpop.eup %2263  ;;  %v1097_v59 = vmul.f32 0.6931472, %v2262_v40 }
 0x31e   : > { %v1697_v52 = vpop.xlane.xlu0 %1696  ;;  %2273 = vlog2.f32 %v1693_v18  ;;  %v1431_v26 = vmul.f32 0.6931472, %v2264_v20  ;;  %v2266_v12 = vpop.eup %2265  ;;  %v1123_v37 = vadd.f32 %v1095_v63, %v3569_v11 }
 0x31f   : > { %2275 = vlog2.f32 %v1403_v46  ;;  %v2268_v61 = vpop.eup %2267  ;;  %v1124_v56 = vadd.f32 %v1097_v59, %v4457_v16  ;;  %v1460_v46 = vadd.f32 %v1433_v53, %v4458_v14  ;;  %v1719_v6 = vmul.f32 0.6931472, %v2266_v12  ;;  %v4461_v16 = vld [vmem:[#allocation36_spill] sm:$0xff]  ;;  %v4462_v53 = vld [vmem:[#allocation67_spill] sm:$0xff] }
 0x320   : > { %v1407_v30 = vpop.xlane.xlu1 %1406  ;;  %2277 = vlog2.f32 %v1691_v43  ;;  %v2270_v13 = vpop.eup %2269  ;;  %v1459_v54 = vadd.f32 %v1431_v26, %v3534_v8  ;;  %v1721_v20 = vmul.f32 0.6931472, %v2268_v61  ;;  %v1187_v11 = vmul.f32 %v4459_v9, %v1123_v37  ;;  %v4463_v8 = vld [vmem:[#allocation6_spill] sm:$0xff]  ;;  %v4465_v9 = vld [vmem:[#allocation87_spill] sm:$0xff] }
 0x321   : > { %2279 = vlog2.f32 %v1060_v1  ;;  %v1437_v59 = vmul.f32 0.6931472, %v2270_v13  ;;  %v1508_v36 = vmul.f32 %v4461_v16, %v1460_v46  ;;  %v1747_v26 = vadd.f32 %v1719_v6, %v4463_v8  ;;  %v4467_v46 = vld [vmem:[#allocation17_spill] sm:$0xff] }
 0x322   : > { %v1066_v15 = vpop.xlane.xlu0 %1065  ;;  %v1507_v14 = vmul.f32 %v4462_v53, %v1459_v54  ;;  %v1748_v61 = vadd.f32 %v1721_v20, %v4464_v38  ;;  %v4469_v38 = vld [vmem:[#allocation58_spill] sm:$0xff]  ;;  %v4471_v53 = vld [vmem:[#allocation60_spill] sm:$0xff] }
 0x323   : > { %v1462_v54 = vadd.f32 %v1437_v59, %v4467_v46  ;;  %v4473_v46 = vld [vmem:[#allocation49_spill] sm:$0xff] }
 0x324   : > { %v1695_v45 = vpop.xlane.xlu1 %1694  ;;  %v1796_v8 = vmul.f32 %v4471_v53, %v1748_v61  ;;  %v4475_v61 = vld [vmem:[#allocation39_spill] sm:$0xff] }
 0x326   : > { %v1413_v57 = vpop.xlane.xlu0 %1412 }
 0x327   : > { %v2272_v18 = vpop.eup %2271 }
 0x328   : > { %v1063_v2 = vpop.xlane.xlu1 %1062  ;;  %v2274_v40 = vpop.eup %2273 }
 0x329   : > { %2281 = vlog2.f32 %v1063_v2  ;;  %v2276_v1 = vpop.eup %2275  ;;  %v4460_v2 = vld [vmem:[#allocation12_spill] sm:$0xff] }
 0x32a   : > { %v3909_v51 = vpop.xlane.xlu0 %1700  ;;  %2283 = vlog2.f32 %v1407_v30  ;;  %v1188_v63 = vmul.f32 %v4460_v2, %v1124_v56  ;;  %v1099_v30 = vmul.f32 0.6931472, %v2272_v18  ;;  %v2278_v49 = vpop.eup %2277  ;;  %v1435_v58 = vmul.f32 0.6931472, %v2276_v1  ;;  %v4466_v56 = vld [vmem:[#allocation42_spill] sm:$0xff] }
 0x32b   : > { %2285 = vlog2.f32 %v1409_v23  ;;  %v1725_v23 = vmul.f32 0.6931472, %v2274_v40  ;;  %v2280_v13 = vpop.eup %2279  ;;  %v4468_v2 = vld [vmem:[#allocation46_spill] sm:$0xff]  ;;  %v1795_v40 = vmul.f32 %v4469_v38, %v1747_v26 }
 0x32c   : > { %2287 = vlog2.f32 %v1066_v15  ;;  %v1283_v15 = vsub.f32 %v1187_v11, %v4465_v9  ;;  %v1284_v18 = vsub.f32 %v1188_v63, %v4466_v56  ;;  %v1125_v6 = vadd.f32 %v1099_v30, %v3678_v17  ;;  %v4472_v9 = vld [vmem:[#allocation23_spill] sm:$0xff] }
 0x32d   : > { %2289 = vlog2.f32 %v1695_v45  ;;  %v1571_v16 = vsub.f32 %v1507_v14, %v4468_v2  ;;  %v1750_v63 = vadd.f32 %v1725_v23, %v4472_v9  ;;  %v1461_v59 = vadd.f32 %v1435_v58, %v3610_v0  ;;  %v4474_v2 = vld [vmem:[#allocation44_spill] sm:$0xff] }
 0x32e   : > { %2291 = vlog2.f32 %v1697_v52  ;;  %v1723_v52 = vmul.f32 0.6931472, %v2278_v49  ;;  %v1101_v56 = vmul.f32 0.6931472, %v2280_v13  ;;  %v1189_v26 = vmul.f32 %v4473_v46, %v1125_v6  ;;  %v4480_v46 = vld [vmem:[#allocation13_spill] sm:$0xff] }
 0x32f   : > { %2293 = vlog2.f32 %v1413_v57  ;;  %v4470_v57 = vld [vmem:[#allocation43_spill] sm:$0xff]  ;;  %v1587_v17 = vadd.f32 %v1571_v16, %v1283_v15  ;;  %v1859_v38 = vsub.f32 %v1795_v40, %v4475_v61  ;;  %v4476_v15 = vld [vmem:[#allocation56_spill] sm:$0xff] }
 0x330   : > { %v1572_v11 = vsub.f32 %v1508_v36, %v4470_v57  ;;  %v3944_v36 = vmul.f32 %v4474_v2, %v1462_v54  ;;  %v1749_v23 = vadd.f32 %v1723_v52, %v3647_v50  ;;  %v1860_v13 = vsub.f32 %v1796_v8, %v4476_v15  ;;  %v4477_v16 = vld [vmem:[#allocation64_spill] sm:$0xff]  ;;  %v4481_v2 = vld [vmem:[#allocation51_spill] sm:$0xff] }
 0x331   : > { %v1411_v42 = vpop.xlane.xlu1 %1410  ;;  %v3950_v57 = vmul.f32 %v4477_v16, %v1750_v63  ;;  %v1875_v54 = vadd.f32 %v1859_v38, %v1587_v17  ;;  %v1285_v52 = vsub.f32 %v1189_v26, %v3698_v7  ;;  %v4479_v63 = vld [vmem:[#allocation62_spill] sm:$0xff]  ;;  %v4482_v61 = vld [vmem:[#allocation71_spill] sm:$0xff] }
 0x332   : > { %v1588_v14 = vadd.f32 %v1572_v11, %v1284_v18  ;;  %v4478_v18 = vld [vmem:[#allocation69_spill] sm:$0xff] }
 0x333   : > { %v2282_v45 = vpop.eup %2281  ;;  %v1509_v6 = vmul.f32 %v4478_v18, %v1461_v59  ;;  %v1797_v59 = vmul.f32 %v4479_v63, %v1749_v23  ;;  %v4484_v18 = vld [vmem:[#allocation14_spill] sm:$0xff] }
 0x334   : > { %v2284_v1 = vpop.eup %2283  ;;  %v1103_v49 = vmul.f32 0.6931472, %v2282_v45  ;;  %v1876_v9 = vadd.f32 %v1860_v13, %v1588_v14  ;;  %v4483_v13 = vld [vmem:[#allocation48_spill] sm:$0xff] }
 0x335   : > { %v1439_v0 = vmul.f32 0.6931472, %v2284_v1  ;;  %v1573_v17 = vsub.f32 %v1509_v6, %v3674_v39  ;;  %v1861_v39 = vsub.f32 %v1797_v59, %v3688_v27  ;;  %v4487_v59 = vld [vmem:[#allocation55_spill] sm:$0xff] }
 0x336   : > { %v1127_v1 = vadd.f32 %v1103_v49, %v3734_v32 }
 0x339   : > { %v1699_v43 = vpop.xlane.xlu1 %1698 }
 0x340   : > { %v1069_v12 = vpop.xlane.xlu1 %1068 }
 0x341   : > { %2295 = vlog2.f32 %v1069_v12  ;;  %v2286_v12 = vpop.eup %2285 }
 0x342   : > { %2297 = vlog2.f32 %v1411_v42  ;;  %v2288_v42 = vpop.eup %2287  ;;  %v1441_v11 = vmul.f32 0.6931472, %v2286_v12 }
 0x343   : > { %v2290_v45 = vpop.eup %2289  ;;  %v1105_v50 = vmul.f32 0.6931472, %v2288_v42 }
 0x344   : > { %v2292_v53 = vpop.eup %2291  ;;  %v1727_v12 = vmul.f32 0.6931472, %v2290_v45  ;;  %v1464_v14 = vadd.f32 %v1441_v11, %v3682_v44 }
 0x345   : > { %v2294_v8 = vpop.eup %2293  ;;  %v1729_v49 = vmul.f32 0.6931472, %v2292_v53  ;;  %v1128_v42 = vadd.f32 %v1105_v50, %v3700_v10  ;;  %v4485_v53 = vld [vmem:[#allocation66_spill] sm:$0xff] }
 0x346   : > { %v1751_v44 = vadd.f32 %v1727_v12, %v3716_v3  ;;  %v1512_v16 = vmul.f32 %v4483_v13, %v1464_v14  ;;  %v4488_v12 = vld [vmem:[#allocation57_spill] sm:$0xff] }
 0x347   : > { %v1192_v6 = vmul.f32 %v4484_v18, %v1128_v42  ;;  %v4491_v14 = vld [vmem:[#allocation73_spill] sm:$0xff] }
 0x349   : > { %v1415_v20 = vpop.xlane.xlu1 %1414 }
 0x351   : > { %v3911_v55 = vpop.xlane.xlu0 %1702 }
 0x355   : > { %v3913_v19 = vpop.xlane.xlu0 %1071 }
 0x356   : > { %2299 = vlog2.f32 %v3913_v19  ;;  %v1126_v19 = vadd.f32 %v1101_v56, %v3666_v25  ;;  %v1463_v25 = vadd.f32 %v1439_v0, %v3706_v41  ;;  %v2296_v56 = vpop.eup %2295  ;;  %v1589_v41 = vadd.f32 %v1573_v17, %v1285_v52 }
 0x357   : > { %2301 = vlog2.f32 %v1699_v43  ;;  %v1574_v43 = vsub.f32 %v3944_v36, %v3712_v35  ;;  %v2298_v32 = vpop.eup %2297  ;;  %v1890_v35 = vadd.f32 %v3907_v28, %v1875_v54  ;;  %v1191_v36 = vmul.f32 %v4481_v2, %v1127_v1  ;;  %v4492_v2 = vld [vmem:[#allocation35_spill] sm:$0xff] }
 0x358   : > { %2303 = vlog2.f32 %v3909_v51  ;;  %v1862_v51 = vsub.f32 %v3950_v57, %v3722_v48  ;;  %v1190_v26 = vmul.f32 %v4480_v46, %v1126_v19  ;;  %v1107_v38 = vmul.f32 0.6931472, %v2296_v56  ;;  %v4490_v46 = vld [vmem:[#allocation50_spill] sm:$0xff] }
 0x359   : > { %v3919_v47 = vpop.xlane.xlu0 %1416  ;;  %v1443_v28 = vmul.f32 0.6931472, %v2298_v32  ;;  %v1877_v45 = vadd.f32 %v1861_v39, %v1589_v41  ;;  %v1287_v19 = vsub.f32 %v1191_v36, %v3746_v31  ;;  %v1891_v11 = vadd.f32 %v1890_v35, %v1876_v9 }
 0x35a   : > { %v1286_v15 = vsub.f32 %v1190_v26, %v3676_v21  ;;  %v1576_v31 = vsub.f32 %v1512_v16, %v3756_v4  ;;  %v4489_v4 = vld [vmem:[#allocation28_spill] sm:$0xff] }
 0x35b   : > { %v1465_v52 = vadd.f32 %v1443_v28, %v3750_v22  ;;  %v1892_v56 = vadd.f32 %v1891_v11, %v1877_v45  ;;  %v4497_v16 = vld [vmem:[#allocation24_spill] sm:$0xff]  ;;  %v4498_v45 = vld [vmem:[#allocation85_spill] sm:$0xff] }
 0x35c   : > { %v1590_v1 = vadd.f32 %v1574_v43, %v1286_v15  ;;  %v4496_v15 = vld [vmem:[#allocation15_spill] sm:$0xff] }
 0x35d   : > { %v3928_v37 = vpop.xlane.xlu0 %1704  ;;  %v1513_v35 = vmul.f32 %v4491_v14, %v1465_v52  ;;  %v4502_v52 = vld [vmem:[#allocation59_spill] sm:$0xff]  ;;  %v4509_v14 = vld [vmem:[#allocation98_spill] sm:$0xff] }
 0x35e   : > { %v1878_v41 = vadd.f32 %v1862_v51, %v1590_v1 }
 0x360   : > { %v1075_v58 = vpop.xlane.xlu1 %1074  ;;  %v2300_v0 = vpop.eup %2299  ;;  %v1893_v18 = vadd.f32 %v1892_v56, %v1878_v41 }
 0x361   : > { %2305 = vlog2.f32 %v1075_v58  ;;  %v1445_v58 = vmul.f32 0.6931472, %v2294_v8  ;;  %v2302_v27 = vpop.eup %2301  ;;  %v1109_v54 = vmul.f32 0.6931472, %v2300_v0  ;;  %v4486_v8 = vld [vmem:[#allocation68_spill] sm:$0xff] }
 0x362   : > { %2307 = vlog2.f32 %v1415_v20  ;;  %v1511_v20 = vmul.f32 %v4482_v61, %v1463_v25  ;;  %v2304_v3 = vpop.eup %2303  ;;  %v1731_v9 = vmul.f32 0.6931472, %v2302_v27  ;;  %v1288_v25 = vsub.f32 %v1192_v6, %v4487_v59  ;;  %v4494_v0 = vld [vmem:[#allocation4_spill] sm:$0xff] }
 0x363   : > { %2309 = vlog2.f32 %v3911_v55  ;;  %v1752_v55 = vadd.f32 %v1729_v49, %v3694_v33  ;;  %v1799_v33 = vmul.f32 %v4485_v53, %v1751_v44  ;;  %v1466_v50 = vadd.f32 %v1445_v58, %v3724_v60 }
 0x364   : > { %v1733_v17 = vmul.f32 0.6931472, %v2304_v3  ;;  %v1130_v60 = vadd.f32 %v1109_v54, %v3740_v29  ;;  %v1753_v36 = vadd.f32 %v1731_v9, %v4492_v2  ;;  %v4499_v3 = vld [vmem:[#allocation94_spill] sm:$0xff]  ;;  %v4503_v9 = vld [vmem:[#allocation53_spill] sm:$0xff] }
 0x365   : > { %v1863_v43 = vsub.f32 %v1799_v33, %v4489_v4  ;;  %v1514_v26 = vmul.f32 %v4490_v46, %v1466_v50  ;;  %v4501_v50 = vld [vmem:[#allocation30_spill] sm:$0xff]  ;;  %v4508_v46 = vld [vmem:[#allocation77_spill] sm:$0xff] }
 0x366   : > { %v1754_v44 = vadd.f32 %v1733_v17, %v4494_v0  ;;  %v1194_v13 = vmul.f32 %v4496_v15, %v1130_v60  ;;  %v4505_v17 = vld [vmem:[#allocation75_spill] sm:$0xff]  ;;  %v4507_v4 = vld [vmem:[#allocation34_spill] sm:$0xff]  ;;  %v4513_v0 = vld [vmem:[#allocation52_spill] sm:$0xff] }
 0x367   : > { %v1578_v51 = vsub.f32 %v1514_v26, %v3788_v34 }
 0x368   : > { %v1290_v34 = vsub.f32 %v1194_v13, %v4501_v50 }
 0x369   : > { %v1419_v7 = vpop.xlane.xlu1 %1418 }
 0x36b   : > { %v2306_v21 = vpop.eup %2305 }
 0x36c   : > { %v1111_v32 = vmul.f32 0.6931472, %v2306_v21  ;;  %v4500_v21 = vld [vmem:[#allocation70_spill] sm:$0xff] }
 0x36e   : > { %v1131_v48 = vadd.f32 %v1111_v32, %v3806_v24 }
 0x370   : > { %v1195_v1 = vmul.f32 %v4502_v52, %v1131_v48  ;;  %v4522_v52 = vld [vmem:[#allocation26_spill] sm:$0xff] }
 0x371   : > { %v3939_v30 = vpop.xlane.xlu0 %1706 }
 0x375   : > { %v1078_v40 = vpop.xlane.xlu0 %1077 }
 0x376   : > { %2311 = vlog2.f32 %v1078_v40  ;;  %v1575_v40 = vsub.f32 %v1511_v20, %v3728_v62 }
 0x377   : > { %2313 = vlog2.f32 %v3919_v47  ;;  %v1129_v47 = vadd.f32 %v1107_v38, %v3766_v5  ;;  %v2308_v5 = vpop.eup %2307  ;;  %v1592_v38 = vadd.f32 %v1576_v31, %v1288_v25 }
 0x378   : > { %v1591_v62 = vadd.f32 %v1575_v40, %v1287_v19  ;;  %v2310_v22 = vpop.eup %2309  ;;  %v1447_v29 = vmul.f32 0.6931472, %v2308_v5  ;;  %v1801_v19 = vmul.f32 %v4498_v45, %v1753_v36  ;;  %v1802_v40 = vmul.f32 %v4500_v21, %v1754_v44  ;;  %v4511_v36 = vld [vmem:[#allocation102_spill] sm:$0xff] }
 0x379   : > { %v1421_v23 = vpop.xlane.xlu0 %1420 }
 0x37a   : > { %v1879_v58 = vadd.f32 %v1863_v43, %v1591_v62  ;;  %v1467_v11 = vadd.f32 %v1447_v29, %v4499_v3  ;;  %v4518_v3 = vld [vmem:[#allocation76_spill] sm:$0xff] }
 0x37c   : > { %v1081_v10 = vpop.xlane.xlu1 %1080  ;;  %v1894_v31 = vadd.f32 %v1893_v18, %v1879_v58  ;;  %v1515_v62 = vmul.f32 %v4505_v17, %v1467_v11 }
 0x37d   : > { %2315 = vlog2.f32 %v1081_v10  ;;  %v1709_v63 = vpop.xlane.xlu0 %1708 }
 0x37e   : > { %2317 = vlog2.f32 %v3928_v37  ;;  %v3987_v37 = vmul.f32 %v4486_v8, %v1752_v55  ;;  %v1577_v55 = vsub.f32 %v1513_v35, %v4497_v16  ;;  %v1866_v35 = vsub.f32 %v1802_v40, %v4509_v14  ;;  %v4517_v16 = vld [vmem:[#allocation61_spill] sm:$0xff]  ;;  %v4520_v40 = vld [vmem:[#allocation79_spill] sm:$0xff] }
 0x37f   : > { %2319 = vlog2.f32 %v1419_v7  ;;  %v1193_v7 = vmul.f32 %v4488_v12, %v1129_v47  ;;  %v1735_v47 = vmul.f32 0.6931472, %v2310_v22  ;;  %v4506_v12 = vld [vmem:[#allocation96_spill] sm:$0xff] }
 0x380   : > { %2321 = vlog2.f32 %v3939_v30  ;;  %v2312_v42 = vpop.eup %2311  ;;  %v4493_v30 = vld [vmem:[#allocation22_spill] sm:$0xff] }
 0x381   : > { %2323 = vlog2.f32 %v1421_v23  ;;  %v1423_v49 = vpop.xlane.xlu1 %1422  ;;  %v2314_v61 = vpop.eup %2313  ;;  %v1864_v20 = vsub.f32 %v3987_v37, %v4493_v30  ;;  %v4495_v23 = vld [vmem:[#allocation92_spill] sm:$0xff]  ;;  %v1113_v27 = vmul.f32 0.6931472, %v2312_v42  ;;  %v4510_v42 = vld [vmem:[#allocation101_spill] sm:$0xff] }
 0x382   : > { %v1289_v10 = vsub.f32 %v1193_v7, %v4495_v23  ;;  %2325 = vlog2.f32 %v1423_v49  ;;  %v1449_v53 = vmul.f32 0.6931472, %v2314_v61  ;;  %v1755_v7 = vadd.f32 %v1735_v47, %v4506_v12  ;;  %v4515_v23 = vld [vmem:[#allocation74_spill] sm:$0xff]  ;;  %v4526_v12 = vld [vmem:[#allocation95_spill] sm:$0xff] }
 0x383   : > { %2327 = vlog2.f32 %v1709_v63  ;;  %v1132_v5 = vadd.f32 %v1113_v27, %v4503_v9  ;;  %v4504_v63 = vld [vmem:[#allocation90_spill] sm:$0xff]  ;;  %v1880_v22 = vadd.f32 %v1864_v20, %v1592_v38  ;;  %v1594_v49 = vadd.f32 %v1578_v51, %v1290_v34  ;;  %v4514_v20 = vld [vmem:[#allocation99_spill] sm:$0xff] }
 0x384   : > { %v1593_v33 = vadd.f32 %v1577_v55, %v1289_v10  ;;  %v1865_v56 = vsub.f32 %v1801_v19, %v4504_v63  ;;  %v1468_v43 = vadd.f32 %v1449_v53, %v4507_v4  ;;  %v1291_v41 = vsub.f32 %v1195_v1, %v4510_v42 }
 0x385   : > { %v1711_v39 = vpop.xlane.xlu0 %1710  ;;  %v1895_v58 = vadd.f32 %v1894_v31, %v1880_v22  ;;  %v1579_v38 = vsub.f32 %v1515_v62, %v4514_v20  ;;  %v1803_v10 = vmul.f32 %v4515_v23, %v1755_v7  ;;  %v4523_v31 = vld [vmem:[#allocation91_spill] sm:$0xff]  ;;  %v4533_v23 = vld [vmem:[#allocation97_spill] sm:$0xff] }
 0x386   : > { %v1881_v2 = vadd.f32 %v1865_v56, %v1593_v33  ;;  %v4521_v33 = vld [vmem:[#allocation100_spill] sm:$0xff]  ;;  %v4525_v56 = vld [vmem:[#allocation10_spill] sm:$0xff] }
 0x387   : > { %v2316_v28 = vpop.eup %2315  ;;  %v1595_v18 = vadd.f32 %v1579_v38, %v1291_v41  ;;  %v1867_v50 = vsub.f32 %v1803_v10, %v4521_v33 }
 0x388   : > { %v2318_v57 = vpop.eup %2317  ;;  %v1115_v24 = vmul.f32 0.6931472, %v2316_v28  ;;  %v1896_v45 = vadd.f32 %v1895_v58, %v1881_v2  ;;  %v4529_v2 = vld [vmem:[#allocation25_spill] sm:$0xff] }
 0x389   : > { %v2320_v6 = vpop.eup %2319  ;;  %v1084_v54 = vpop.xlane.xlu0 %1083  ;;  %v1737_v8 = vmul.f32 0.6931472, %v2318_v57  ;;  %v4516_v57 = vld [vmem:[#allocation72_spill] sm:$0xff]  ;;  %v1883_v22 = vadd.f32 %v1867_v50, %v1595_v18 }
 0x38a   : > { %2329 = vlog2.f32 %v1084_v54  ;;  %v1451_v37 = vmul.f32 0.6931472, %v2320_v6  ;;  %v2322_v25 = vpop.eup %2321  ;;  %v1133_v26 = vadd.f32 %v1115_v24, %v4508_v46  ;;  %v1516_v51 = vmul.f32 %v4516_v57, %v1468_v43  ;;  %v4519_v54 = vld [vmem:[#allocation89_spill] sm:$0xff] }
 0x38b   : > { %2331 = vlog2.f32 %v1711_v39  ;;  %v2324_v32 = vpop.eup %2323  ;;  %v4512_v39 = vld [vmem:[#allocation21_spill] sm:$0xff]  ;;  %v1756_v44 = vadd.f32 %v1737_v8, %v4513_v0  ;;  %v1739_v15 = vmul.f32 0.6931472, %v2322_v25  ;;  %v1882_v6 = vadd.f32 %v1866_v35, %v1594_v49  ;;  %v4528_v49 = vld [vmem:[#allocation32_spill] sm:$0xff]  ;;  %v4531_v0 = vld [vmem:[#allocation18_spill] sm:$0xff] }
 0x38c   : > { %v1087_v59 = vpop.xlane.xlu1 %1086  ;;  %v1469_v29 = vadd.f32 %v1451_v37, %v4511_v36  ;;  %v1196_v61 = vmul.f32 %v4512_v39, %v1132_v5  ;;  %v2326_v28 = vpop.eup %2325  ;;  %v1453_v13 = vmul.f32 0.6931472, %v2324_v32  ;;  %v1197_v55 = vmul.f32 %v4517_v16, %v1133_v26  ;;  %v4527_v26 = vld [vmem:[#allocation78_spill] sm:$0xff]  ;;  %v4534_v16 = vld [vmem:[#allocation63_spill] sm:$0xff] }
 0x38d   : > { %2333 = vlog2.f32 %v1087_v59  ;;  %v1787_v60 = vpop.xlane.xlu0 %1786  ;;  %v2328_v27 = vpop.eup %2327  ;;  %v1455_v47 = vmul.f32 0.6931472, %v2326_v28  ;;  %v1804_v53 = vmul.f32 %v4520_v40, %v1756_v44  ;;  %v1757_v1 = vadd.f32 %v1739_v15, %v4522_v52  ;;  %v4524_v59 = vld [vmem:[#allocation103_spill] sm:$0xff] }
 0x38e   : > { %v1517_v11 = vmul.f32 %v4518_v3, %v1469_v29  ;;  %v1292_v21 = vsub.f32 %v1196_v61, %v4519_v54  ;;  %v1470_v8 = vadd.f32 %v1453_v13, %v4523_v31  ;;  %v1741_v5 = vmul.f32 0.6931472, %v2328_v27  ;;  %v4530_v29 = vld [vmem:[#allocation84_spill] sm:$0xff] }
 0x38f   : > { %v1580_v25 = vsub.f32 %v1516_v51, %v4524_v59  ;;  %v1293_v17 = vsub.f32 %v1197_v55, %v4525_v56  ;;  %v1805_v32 = vmul.f32 %v1787_v60, %v1757_v1  ;;  %v1897_v4 = vadd.f32 %v1896_v45, %v1882_v6  ;;  %v4532_v60 = vld [vmem:[#allocation93_spill] sm:$0xff]  ;;  %v4535_v6 = vld [vmem:[#allocation16_spill] sm:$0xff] }
 0x390   : > { %v1849_v30 = vpop.xlane.xlu1 %1848  ;;  %v1471_v14 = vadd.f32 %v1455_v47, %v4527_v26  ;;  %v1581_v42 = vsub.f32 %v1517_v11, %v4528_v49  ;;  %v1518_v39 = vmul.f32 %v4530_v29, %v1470_v8  ;;  %v1758_v28 = vadd.f32 %v1741_v5, %v4532_v60  ;;  %v4536_v11 = vld [vmem:[#allocation5_spill] sm:$0xff] }
 0x391   : > { %v1503_v48 = vpop.xlane.xlu0 %1502  ;;  %v1868_v63 = vsub.f32 %v1804_v53, %v1849_v30  ;;  %v1596_v46 = vadd.f32 %v1580_v25, %v1292_v21  ;;  %v1898_v38 = vadd.f32 %v1897_v4, %v1883_v22 }
 0x392   : > { %v1597_v20 = vadd.f32 %v1581_v42, %v1293_v17  ;;  %v1519_v13 = vmul.f32 %v1503_v48, %v1471_v14 }
 0x393   : > { %v1884_v58 = vadd.f32 %v1868_v63, %v1596_v46 }
 0x394   : > { %v2330_v19 = vpop.eup %2329  ;;  %v1565_v24 = vpop.xlane.xlu1 %1564 }
 0x395   : > { %v1117_v34 = vmul.f32 0.6931472, %v2330_v19  ;;  %v1789_v37 = vpop.xlane.xlu0 %1788  ;;  %v2332_v9 = vpop.eup %2331  ;;  %v1582_v15 = vsub.f32 %v1518_v39, %v1565_v24  ;;  %v1899_v3 = vadd.f32 %v1898_v38, %v1884_v58 }
 0x396   : > { %v1743_v41 = vmul.f32 0.6931472, %v2332_v9  ;;  %v1806_v57 = vmul.f32 %v1789_v37, %v1758_v28 }
 0x397   : > { %v2334_v62 = vpop.eup %2333  ;;  %v1134_v7 = vadd.f32 %v1117_v34, %v4526_v12 }
 0x398   : > { %v1119_v43 = vmul.f32 0.6931472, %v2334_v62  ;;  %v1851_v35 = vpop.xlane.xlu1 %1850  ;;  %v1759_v45 = vadd.f32 %v1743_v41, %v4535_v6 }
 0x399   : > { %v1198_v36 = vmul.f32 %v4529_v2, %v1134_v7  ;;  %v1869_v61 = vsub.f32 %v1805_v32, %v1851_v35  ;;  %v1567_v30 = vpop.xlane.xlu0 %1566 }
 0x39a   : > { %v1135_v44 = vadd.f32 %v1119_v43, %v4531_v0  ;;  %v1583_v54 = vsub.f32 %v1519_v13, %v1567_v30 }
 0x39b   : > { %v1294_v10 = vsub.f32 %v1198_v36, %v4533_v23  ;;  %v1885_v51 = vadd.f32 %v1869_v61, %v1597_v20 }
 0x39c   : > { %v1199_v55 = vmul.f32 %v4534_v16, %v1135_v44  ;;  %v1791_v27 = vpop.xlane.xlu1 %1790 }
 0x39d   : > { %v1598_v18 = vadd.f32 %v1582_v15, %v1294_v10  ;;  %v1853_v19 = vpop.xlane.xlu0 %1852  ;;  %v1807_v40 = vmul.f32 %v1791_v27, %v1759_v45  ;;  %v1900_v53 = vadd.f32 %v1899_v3, %v1885_v51 }
 0x39e   : > { %v1295_v47 = vsub.f32 %v1199_v55, %v4536_v11  ;;  %v1870_v21 = vsub.f32 %v1806_v57, %v1853_v19 }
 0x3a0   : > { %v1599_v24 = vadd.f32 %v1583_v54, %v1295_v47  ;;  %v1886_v48 = vadd.f32 %v1870_v21, %v1598_v18  ;;  %v1855_v33 = vpop.xlane.xlu1 %1854 }
 0x3a1   : > { %v1871_v50 = vsub.f32 %v1807_v40, %v1855_v33 }
 0x3a2   : > { %v1901_v34 = vadd.f32 %v1900_v53, %v1886_v48 }
 0x3a3   : > { %v1887_v52 = vadd.f32 %v1871_v50, %v1599_v24 }
 0x3a5   : > { %v1902_v1 = vadd.f32 %v1901_v34, %v1887_v52 }
 0x3a7   : > { %v1903_v31 = vrot.slane %v1902_v1, 4 }
 0x3a9   : > { %v1904_v8 = vadd.f32 %v1903_v31, %v1902_v1 }
 0x3ab   : > { %v1905_v37 = vrot.slane %v1904_v8, 2 }
 0x3ad   : > { %v1906_v9 = vadd.f32 %v1905_v37, %v1904_v8 }
 0x3af   : > { %v1907_v5 = vrot.slane %v1906_v9, 1 }
 0x3b1   : > { %v1908_v59 = vadd.f32 %v1907_v5, %v1906_v9 }
 0x3b3   : > { %v1909_v25 = vmul.f32 0.33333334, %v1908_v59 }
 0x3b5   : > { %1910 = vst [vmem:[%s222_s25] sm:$0xff] %v1909_v25 }
 0x3b6 PF: > { %s14_s15 = sadd.s32 1, %s2343_s15  }
 0x3b7   : > { %p11_p5 = scmp.ge.s32.totalorder %s14_s15, 4  }
 0x3b9   :  { %13 = sbr.rel (!%p11_p5) target bundleno = 1 (0x1), region = 69 }

</bundles_post_ra>
